<compile_context>
chip_gen: v6e
topology: v6e:2x2x1
jax: 0.10.0
libtpu: 0.0.40
codegen_flags: <defaults>
</compile_context>

<pallas_src>
import functools

import jax
import jax.numpy as jnp
from jax.experimental import pallas as pl
from jax.experimental.pallas import tpu as pltpu


def _round_up(v, m):
    return ((v + m - 1) // m) * m


# ----------------------------- Pallas kernel --------------------------------
def _lcrnet_outputs_kernel(x_ref, w_ref, b_ref, out_ref, *, num_classes):
    # x tile: (TN, D); fused weight: (D, Wpad); fused bias: (1, Wpad).
    # Single fused matmul for both heads, f32 accumulation on the MXU.
    z = jnp.dot(x_ref[...], w_ref[...], preferred_element_type=jnp.float32)
    z = z + b_ref[...]                                     # (TN, Wpad)

    tn, wpad = z.shape
    col = jax.lax.broadcasted_iota(jnp.int32, (tn, wpad), 1)
    is_cls = col < num_classes                             # first C lanes = cls logits

    # --- classification branch: masked row-wise softmax over the cls lanes ---
    logits = jnp.where(is_cls, z, -jnp.inf)
    m = jnp.max(logits, axis=-1, keepdims=True)
    e = jnp.exp(logits - m)                                # exp(-inf) = 0 outside cls
    denom = jnp.sum(e, axis=-1, keepdims=True)             # >= 1 (max lane contributes 1)
    probs = e * pl.reciprocal(denom, approx=True)          # EUP vrcp, VALU stays free

    # --- pose branch: (x @ W_pose + b_pose) / 5.0  (padded lanes are 0) ------
    pose = z * jnp.float32(0.2)

    # Lane-dense combined slab: [probs | pose_pred | zeros]
    out_ref[...] = jnp.where(is_cls, probs, pose).astype(out_ref.dtype)


# ------------------------------- wrapper -------------------------------------
def lcrnet_outputs_forward(x, cls_w, cls_b, pose_w, pose_b, *, tile_n=256):
    """Pallas implementation of lcrnet_outputs.forward (inference mode).

    x       : (N, D) or (N, D, 1, 1), float32 or bfloat16
    cls_w   : (D, C)   (pre-transposed vs. torch's (C, D))
    cls_b   : (C,)
    pose_w  : (D, P)
    pose_b  : (P,)
    returns : (cls_score (N, C) softmaxed, pose_pred (N, P))
    """
    if x.ndim == 4:
        # matches: x = x.squeeze(3).squeeze(2)
        x = x.reshape(x.shape[0], x.shape[1])

    n, d = x.shape
    c = cls_w.shape[1]
    p = pose_w.shape[1]
    w_total = c + p
    w_pad = _round_up(w_total, 128)       # lane-dense output width
    dtype = x.dtype

    # Fuse both heads into one [D, Wpad] weight (zero-padded) + [1, Wpad] bias.
    # Weights are cast to the input dtype so the MXU runs at bf16 rate when
    # x is bf16; accumulation stays f32 inside the kernel.
    w = jnp.zeros((d, w_pad), dtype=dtype)
    w = w.at[:, :c].set(cls_w.astype(dtype))
    w = w.at[:, c:w_total].set(pose_w.astype(dtype))
    b = jnp.zeros((1, w_pad), dtype=jnp.float32)
    b = b.at[0, :c].set(cls_b.astype(jnp.float32))
    b = b.at[0, c:w_total].set(pose_b.astype(jnp.float32))

    # Big row tiles; clamp for small N (keep sublane-divisible).
    tile = min(int(tile_n), _round_up(n, 8))
    grid = (pl.cdiv(n, tile),)

    itemsize = jnp.dtype(dtype).itemsize
    cost = pl.CostEstimate(
        flops=2 * n * d * w_pad,
        transcendentals=n * c,
        bytes_accessed=(n * d * itemsize            # x
                        + d * w_pad * itemsize      # fused weights
                        + w_pad * 4                 # bias
                        + n * w_pad * itemsize),    # fused output
    )

    fused_out = pl.pallas_call(
        functools.partial(_lcrnet_outputs_kernel, num_classes=c),
        out_shape=jax.ShapeDtypeStruct((n, w_pad), dtype),
        grid_spec=pltpu.PrefetchScalarGridSpec(
            num_scalar_prefetch=0,
            grid=grid,
            in_specs=[
                pl.BlockSpec((tile, d), lambda i: (i, 0)),     # x row tile
                pl.BlockSpec((d, w_pad), lambda i: (0, 0)),    # fused weights (resident)
                pl.BlockSpec((1, w_pad), lambda i: (0, 0)),    # fused bias    (resident)
            ],
            out_specs=pl.BlockSpec((tile, w_pad), lambda i: (i, 0)),
        ),
        compiler_params=pltpu.CompilerParams(
            dimension_semantics=("parallel",),     # shards row tiles across TCs on v7x
        ),
        cost_estimate=cost,
    )(x, w, b)

    cls_score = fused_out[:, :c]
    pose_pred = fused_out[:, c:w_total]
    return cls_score, pose_pred


# --------------------------- parameter construction --------------------------
def init_lcrnet_outputs_params(key, dim_in, num_classes, njoints,
                               cls_agnostic_bbox_reg=False):
    """Deterministic init matching lcrnet_outputs._init_weights:
       cls_score.weight ~ N(0, 0.01), bias = 0
       pose_pred.weight ~ N(0, 0.001), bias = 0
    Weights are stored transposed: (dim_in, out)."""
    pred_per_joint = 5 * njoints
    pose_out = pred_per_joint * 2 if cls_agnostic_bbox_reg else pred_per_joint * num_classes

    k1, k2 = jax.random.split(key)
    cls_w = 0.01 * jax.random.normal(k1, (dim_in, num_classes), dtype=jnp.float32)
    cls_b = jnp.zeros((num_classes,), dtype=jnp.float32)
    pose_w = 0.001 * jax.random.normal(k2, (dim_in, pose_out), dtype=jnp.float32)
    pose_b = jnp.zeros((pose_out,), dtype=jnp.float32)
    return cls_w, cls_b, pose_w, pose_b


# pure-JAX reference for correctness checking
def _reference(x, cls_w, cls_b, pose_w, pose_b):
    if x.ndim == 4:
        x = x.reshape(x.shape[0], x.shape[1])
    logits = x @ cls_w + cls_b
    cls_score = jax.nn.softmax(logits, axis=1)
    pose_pred = (x @ pose_w + pose_b) / 5.0
    return cls_score, pose_pred


if __name__ == "__main__":
    # Small synthetic shapes consistent with the head:
    #   N = 512 RoIs, dim_in = 256 box-feature dim,
    #   NUM_CLASSES = 8, njoints J = 4  ->  pose dim = 5*J*NUM_CLASSES = 160.
    # With tile_n=256 the grid has 2 parallel steps (both TCs busy on v7x).
    N, DIM_IN = 512, 256
    NUM_CLASSES, NJOINTS = 8, 4

    key = jax.random.PRNGKey(0)
    kx, kp, kb1, kb2 = jax.random.split(key, 4)

    # box feature as produced by Box_Head, NCHW with 1x1 spatial (4-D branch)
    x = jax.random.normal(kx, (N, DIM_IN, 1, 1), dtype=jnp.float32)

    cls_w, cls_b, pose_w, pose_b = init_lcrnet_outputs_params(
        kp, DIM_IN, NUM_CLASSES, NJOINTS, cls_agnostic_bbox_reg=False)
    # non-zero biases so the bias path is actually exercised
    cls_b = 0.05 * jax.random.normal(kb1, cls_b.shape, dtype=jnp.float32)
    pose_b = 0.05 * jax.random.normal(kb2, pose_b.shape, dtype=jnp.float32)

    cls_score, pose_pred = lcrnet_outputs_forward(x, cls_w, cls_b, pose_w, pose_b)
    jax.block_until_ready((cls_score, pose_pred))

    # sanity check against pure-JAX reference
    ref_cls, ref_pose = _reference(x, cls_w, cls_b, pose_w, pose_b)
    assert cls_score.shape == (N, NUM_CLASSES)
    assert pose_pred.shape == (N, 5 * NJOINTS * NUM_CLASSES)
    # cls uses the approximate EUP reciprocal -> ~1e-3 relative precision
    assert jnp.allclose(cls_score, ref_cls, atol=2e-3, rtol=2e-3)
    assert jnp.allclose(pose_pred, ref_pose, atol=1e-4, rtol=1e-3)

    print("KERNEL_OK")
</pallas_src>

<mosaic_0001>
module attributes {stable_mosaic.version = 11 : i64} {
  func.func @_lcrnet_outputs_kernel(%arg0: i32, %arg1: memref<256x256xf32, #tpu.memory_space<vmem>>, %arg2: memref<256x256xf32, #tpu.memory_space<vmem>>, %arg3: memref<1x256xf32, #tpu.memory_space<vmem>>, %arg4: memref<256x256xf32, #tpu.memory_space<vmem>>) attributes {dimension_semantics = [#tpu.dimension_semantics<parallel>], iteration_bounds = array<i64: 2>, scalar_prefetch = 0 : i64, scratch_operands = 0 : i64, tpu.core_type = #tpu.core_type<tc>, window_params = [{transform_indices = @transform_0, window_bounds = array<i64: 256, 256>}, {pipeline_mode = #tpu.pipeline_mode<synchronous>, transform_indices = @transform_1, window_bounds = array<i64: 256, 256>}, {pipeline_mode = #tpu.pipeline_mode<synchronous>, transform_indices = @transform_2, window_bounds = array<i64: 1, 256>}, {transform_indices = @transform_3, window_bounds = array<i64: 256, 256>}]} {
    %c0 = arith.constant 0 : index
    %c0_0 = arith.constant 0 : index
    %0 = vector.load %arg1[%c0, %c0_0] : memref<256x256xf32, #tpu.memory_space<vmem>>, vector<256x256xf32>
    %c0_1 = arith.constant 0 : index
    %c0_2 = arith.constant 0 : index
    %1 = vector.load %arg2[%c0_1, %c0_2] : memref<256x256xf32, #tpu.memory_space<vmem>>, vector<256x256xf32>
    %cst = arith.constant dense<0.000000e+00> : vector<256x256xf32>
    %2 = tpu.matmul %0, %1, %cst {dimension_numbers = #tpu.dot_dimension_numbers<[1], [0], [0], [1], [0, 0, 1, 1], [], []>} : vector<256x256xf32>, vector<256x256xf32>, vector<256x256xf32> -> vector<256x256xf32>
    %c0_3 = arith.constant 0 : index
    %c0_4 = arith.constant 0 : index
    %3 = vector.load %arg3[%c0_3, %c0_4] : memref<1x256xf32, #tpu.memory_space<vmem>>, vector<1x256xf32>
    %4 = vector.broadcast %3 : vector<1x256xf32> to vector<256x256xf32>
    %5 = arith.addf %2, %4 : vector<256x256xf32>
    %6 = tpu.iota {dimensions = array<i32: 1>} : vector<256x256xi32>
    %c8_i32 = arith.constant 8 : i32
    %7 = vector.broadcast %c8_i32 : i32 to vector<256x256xi32>
    %8 = arith.cmpi slt, %6, %7 : vector<256x256xi32>
    %cst_5 = arith.constant 0xFF800000 : f32
    %9 = vector.broadcast %cst_5 : f32 to vector<256x256xf32>
    %10 = arith.select %8, %5, %9 : vector<256x256xi1>, vector<256x256xf32>
    %cst_6 = arith.constant dense<0xFF800000> : vector<256xf32>
    %11 = vector.multi_reduction <maximumf>, %10, %cst_6 [1] : vector<256x256xf32> to vector<256xf32>
    %12 = vector.shape_cast %11 : vector<256xf32> to vector<256x1xf32>
    %13 = vector.broadcast %12 : vector<256x1xf32> to vector<256x256xf32>
    %14 = arith.subf %10, %13 : vector<256x256xf32>
    %15 = math.exp %14 : vector<256x256xf32>
    %cst_7 = arith.constant dense<0.000000e+00> : vector<256xf32>
    %16 = vector.multi_reduction <add>, %15, %cst_7 [1] : vector<256x256xf32> to vector<256xf32>
    %17 = vector.shape_cast %16 : vector<256xf32> to vector<256x1xf32>
    %18 = tpu.reciprocal %17 {approx = true} : vector<256x1xf32> -> vector<256x1xf32>
    %19 = vector.broadcast %18 : vector<256x1xf32> to vector<256x256xf32>
    %20 = arith.mulf %15, %19 : vector<256x256xf32>
    %cst_8 = arith.constant 2.000000e-01 : f32
    %21 = vector.broadcast %cst_8 : f32 to vector<256x256xf32>
    %22 = arith.mulf %5, %21 : vector<256x256xf32>
    %23 = arith.select %8, %20, %22 : vector<256x256xi1>, vector<256x256xf32>
    %c0_9 = arith.constant 0 : index
    %c0_10 = arith.constant 0 : index
    %24 = vector.load %arg4[%c0_9, %c0_10] : memref<256x256xf32, #tpu.memory_space<vmem>>, vector<256x256xf32>
    tpu.vector_store %arg4[%c0_9, %c0_10], %23 {strides = array<i32>} : memref<256x256xf32, #tpu.memory_space<vmem>>, vector<256x256xf32>,
    return
  }
  func.func @transform_0(%arg0: i32) -> (i32, i32) {
    %c0_i32 = arith.constant 0 : i32
    %c0_i32_0 = arith.constant 0 : i32
    return %arg0, %c0_i32 : i32, i32
  }
  func.func @transform_1(%arg0: i32) -> (i32, i32) {
    %c0_i32 = arith.constant 0 : i32
    %c0_i32_0 = arith.constant 0 : i32
    %c0_i32_1 = arith.constant 0 : i32
    return %c0_i32, %c0_i32_0 : i32, i32
  }
  func.func @transform_2(%arg0: i32) -> (i32, i32) {
    %c0_i32 = arith.constant 0 : i32
    %c0_i32_0 = arith.constant 0 : i32
    %c0_i32_1 = arith.constant 0 : i32
    return %c0_i32, %c0_i32_0 : i32, i32
  }
  func.func @transform_3(%arg0: i32) -> (i32, i32) {
    %c0_i32 = arith.constant 0 : i32
    %c0_i32_0 = arith.constant 0 : i32
    return %arg0, %c0_i32 : i32, i32
  }
}

</mosaic_0001>

<bundles_post_ra>
// kernel: tpu_custom_call.1
= control target key start
LH: loop header
LB: loop body
LE: loop exit
PB: predicated region body
PF: predicated region fallthrough
CT: control target
= control target key end

     0   :  { %8 = vsyncpa [#allocation3], 0  ;;  %s2839_s0 = inlined_call_operand.hbm [shape: f32[512,256], index: 0, kind: input, shape index: {}]   ;;  %s2840_s1 = inlined_call_operand.hbm [shape: f32[256,256], index: 1, kind: input, shape index: {}]   ;;  %s2841_s2 = inlined_call_operand.vmem [shape: f32[1,256], index: 2, kind: input, shape index: {}]   ;;  %s2842_s3 = inlined_call_operand.hbm [shape: f32[512,256], index: 3, kind: output, shape index: {}]  }
   0x1   :  { %10 = vsyncpa [#allocation3 + $0x1], 0 }
   0x2   :  { %11 = vsyncpa [#allocation6], 0 }
   0x3   :  { %12 = vsyncpa [#allocation4], 0 }
   0x4   :  { %14 = vsyncpa [#allocation4 + $0x1], 0  ;;  %s1933_s12 = smov 0   ;;  %s1935_s13 = smov 0  }
   0x5   :  { %s1937_s14 = smov 0   ;;  %s1939_s15 = smov 0  }
   0x6 LB: > { %s1954_s16 = sadd.s32 4294967295, %s1904_s15   ;;  %s1443_s17 = sadd.s32 4294967294, %s1904_s15   ;;  %s1904_s15 = sphi %s1939_s15, %s2918_s15   ;;  %s1900_s14 = sphi %s1937_s14, %s2917_s14   ;;  %s1896_s13 = sphi %s1935_s13, %s2916_s13   ;;  %s1892_s12 = sphi %s1933_s12, %s2915_s12  }
   0x7   : > { %p40_p0 = scmp.ne.s32.totalorder %s1896_s13, %s1892_s12  ;;  %p2843_p1 = scmp.eq.s32.totalorder %s1954_s16, 0 }
   0x8   : > { %p112_p3 = scmp.eq.s32.totalorder %s1443_s17, 1  ;;  %p1444_p5 = scmp.ge.s32.totalorder %s1904_s15, 1 }
   0x9   : > { %p1963_p4 = por %p2843_p1, %p40_p0  ;;  %p119_p7 = scmp.lt.s32.totalorder %s1904_s15, 3 }
   0xa   : > { %p1968_p6 = por %p112_p3, %p40_p0  ;;  %s1906_s21 = smov [#allocation5]  }
   0xb   : > { %s2865_s18 = scalar_select %p1963_p4, 1, 0 }
   0xc   : > { %s2866_s19 = scalar_select %p1968_p6, 1, 0 }
   0xd   : > { %p1973_p8 = pnand %p1444_p5, %p119_p7  ;;  %s131_s22 = sshll.u32 %s1906_s21, 4  ;;  %s132_s22 = int_to_ptr.vmem [resolvable:$true] %s131_s22 }
   0xe   : > { %s1987_s24 = sadd.s32 1, %s1904_s15   ;;  %s27_s25 = sadd.s32 1, %s1900_s14 }
   0xf   : > { %s2867_s20 = scalar_select %p1973_p8, 1, 0 }
  0x10   : > { %p1537_p9 = pneg %p1973_p8  ;;  %s24_s26 = ssub.s32 %s1904_s15, %s1987_s24 }
  0x11   : > { %s1793_s27 = scalar_lea.vmem %s132_s22, 8192  ;;  %p1801_p5 = scmp.lt.s32.totalorder %s132_s22, %s132_s22 }
  0x12   : > { %p1982_p11 = pnand %p1537_p9, %p2843_p1  ;;  %p1794_p13 = scmp.ne.s32.totalorder %s132_s22, %s1793_s27 }
  0x13   : > { %p1802_p7 = scmp.lt.s32.totalorder %s1793_s27, %s1793_s27 }
  0x14   : > { %p1784_p12 = pneg %p1982_p11 }
  0x15   : > { %p1803_p10 = por %p1802_p7, %p1801_p5 }
  0x16   : > { %p1796_p0 = pnand %p1794_p13, %p1784_p12 }
  0x18   : > { %p1797_p3 = pneg %p1796_p0 }
  0x1a   : > { %p1804_p2 = pnand %p1803_p10, %p1797_p3 }
  0x1c   : > { %1807 = shalt.err (!%p1804_p2)
}
  0x1d   : > { %s1907_s28 = smov 256   ;;  %s1908_s29 = smov 16  }
  0x1e   : > { %1540 = dma.hbm_to_vmem [thread:$0]  (!%p1982_p11), %s2840_s1, 8192, %s132_s22, [#allocation6], %s1907_s28, %s1907_s28, %s1908_s29  }
  0x1f   : > { %p25_p2 = scmp.eq.s32.totalorder %s24_s26, 0  ;;  %p34_p9 = scmp.ne.s32.totalorder %s1900_s14, %s1896_s13 }
  0x20   : > { %p35_p10 = scmp.eq.s32.totalorder %s1904_s15, 0  ;;  %p1550_p12 = scmp.lt.s32.totalorder %s1904_s15, 2 }
  0x21   : > { %s2007_s5 = scalar_select %p25_p2, %s1900_s14, %s27_s25  }
  0x22   : > { %p36_p13 = por %p35_p10, %p34_p9  ;;  %p2869_p0 = scmp.eq.s32.totalorder %s1954_s16, 1 }
  0x23   : > { %s148_s7 = sand.u32 1, %s1900_s14   ;;  %s1462_s8 = sshll.u32 %s1904_s15, 13 }
  0x24   : > { %p2011_p3 = por %p2869_p0, %p34_p9  ;;  %s1447_s9 = sshll.u32 %s148_s7, 9 }
  0x25   : > { %s2020_s17 = scalar_lea.hbm %s2839_s0, %s1462_s8  ;;  %s152_s21 = scalar_lea.vmem [#allocation2], %s1447_s9 }
  0x26   : > { %s2870_s6 = scalar_select %p2011_p3, 1, 0 }
  0x27   : > { %s160_s22 = sshll.u32 %s152_s21, 4  ;;  %p2022_p11 = pnand %p1550_p12, %p36_p13  ;;  %s2026_s22 = int_to_ptr.vmem [resolvable:$true] %s160_s22 }
  0x28   : > { %s2028_s25 = scalar_lea.sflag [#allocation3], %s148_s7  ;;  %s1808_s26 = scalar_lea.hbm %s2020_s17, 8192 }
  0x29   : > { %p1809_p5 = scmp.ne.s32.totalorder %s2020_s17, %s1808_s26  ;;  %p1810_p7 = pneg %p2022_p11 }
  0x2a   : > { %s1813_s4 = scalar_lea.hbm %s2839_s0, 16384  ;;  %p1814_p10 = scmp.lt.s32.totalorder %s2020_s17, %s2839_s0 }
  0x2b   : > { %p1811_p2 = pnand %p1810_p7, %p1809_p5  ;;  %p1815_p12 = scmp.lt.s32.totalorder %s1813_s4, %s1808_s26 }
  0x2d   : > { %p1812_p9 = pneg %p1811_p2  ;;  %p1816_p13 = por %p1815_p12, %p1814_p10 }
  0x2f   : > { %p1817_p0 = pnand %p1816_p13, %p1812_p9 }
  0x31   : > { %1820 = shalt.err (!%p1817_p0)
}
  0x32   : > { %s1821_s7 = scalar_lea.vmem %s2026_s22, 8192  ;;  %s1909_s10 = smov [#allocation2]  }
  0x33   : > { %p1822_p1 = scmp.ne.s32.totalorder %s2026_s22, %s1821_s7  ;;  %s1826_s11 = sshll.u32 %s1909_s10, 4  ;;  %s1827_s11 = int_to_ptr.vmem [resolvable:$false] %s1826_s11 }
  0x34   : > { %s1828_s21 = scalar_lea.vmem %s1827_s11, 16384  ;;  %p1829_p2 = scmp.lt.s32.totalorder %s2026_s22, %s1827_s11 }
  0x35   : > { %p1824_p6 = pnand %p1822_p1, %p1810_p7  ;;  %p1830_p3 = scmp.lt.s32.totalorder %s1828_s21, %s1821_s7 }
  0x37   : > { %p1825_p5 = pneg %p1824_p6  ;;  %p1831_p4 = por %p1830_p3, %p1829_p2 }
  0x39   : > { %p1832_p8 = pnand %p1831_p4, %p1825_p5 }
  0x3b   : > { %1835 = shalt.err (!%p1832_p8)
}
  0x3c   : > { %1544 = dma.hbm_to_vmem [thread:$0]  (!%p2022_p11), %s2020_s17, 8192, %s2026_s22, %s2028_s25, %s1907_s28, %s1907_s28, %s1908_s29  }
  0x3d   : > { %p2872_p1 = scmp.ne.s32.totalorder %s2867_s20, 0 }
  0x3f   : > { %172 = sbr.rel (%p2872_p1) target bundleno = 735 (0x2df), region = 32 }
  0x44   : > { %s2055_s26 = sand.u32 1, %s1896_s13   ;;  %p2873_p4 = scmp.ne.s32.totalorder %s2865_s18, 0 }
  0x45   : > { %s1452_s27 = sshll.u32 %s2055_s26, 9  ;;  %s175_s30 = scalar_lea.sflag [#allocation3], %s2055_s26 }
  0x46   : > { %s2061_s23 = scalar_lea.vmem [#allocation2], %s1452_s27 }
  0x47   : > { %1879 = dma.done.wait (%p2873_p4), %s175_s30, 8192  }
  0x48   : > { %1881 = vsyncadd (%p2873_p4), %s175_s30, 4294959104  ;;  %p2874_p6 = scmp.eq.s32.totalorder %s1954_s16, 0 }
  0x4a   : > { %1883 = dma.done.wait (%p2874_p6), [#allocation6], 8192   ;;  %p2875_p8 = pmov %p2874_p6 }
  0x4b   : > { %v302_v0 = vld [vmem:[#allocation5 + $0xf8] sm:$0xff]  ;;  %v301_v1 = vld [vmem:[#allocation5 + $0xf0] sm:$0xff]  ;;  %v300_v2 = vld [vmem:[#allocation5 + $0xe8] sm:$0xff]  ;;  %s2172_s28 = scalar_lea.vmem [#allocation7], %s1452_s27  ;;  %s1464_s29 = sshll.u32 %s1954_s16, 13 }
  0x4c   : > { %1885 = vsyncadd (%p2875_p8), [#allocation6], 4294959104  ;;  %347 = vmatprep.subr.mxu0 %v302_v0  ;;  %1465 = vmatprep.subr.mxu1 %v302_v0  ;;  %v299_v3 = vld [vmem:[#allocation5 + $0xe0] sm:$0xff]  ;;  %v298_v4 = vld [vmem:[#allocation5 + $0xd8] sm:$0xff]  ;;  %s1360_s17 = sshll.u32 %s2172_s28, 4  ;;  %s2791_s4 = scalar_lea.hbm %s2842_s3, %s1464_s29  ;;  %s2793_s17 = int_to_ptr.vmem [resolvable:$true] %s1360_s17 }
  0x4d   : > { %348 = vmatpush1.msra.mxu0 %v301_v1  ;;  %1497 = vmatpush1.msra.mxu1 %v301_v1  ;;  %v297_v5 = vld [vmem:[#allocation5 + $0xd0] sm:$0xff]  ;;  %v296_v6 = vld [vmem:[#allocation5 + $0xc8] sm:$0xff]  ;;  %v295_v7 = vld [vmem:[#allocation5 + $0xc0] sm:$0xff]  ;;  %s1346_s16 = scalar_lea.sflag [#allocation4], %s2055_s26  ;;  %s1836_s8 = scalar_lea.vmem %s2793_s17, 8192 }
  0x4e   : > { %349 = vmatprep.subr.mxu0 %v300_v2  ;;  %1466 = vmatprep.subr.mxu1 %v300_v2  ;;  %v294_v8 = vld [vmem:[#allocation5 + $0xb8] sm:$0xff]  ;;  %v293_v9 = vld [vmem:[#allocation5 + $0xb0] sm:$0xff]  ;;  %v292_v10 = vld [vmem:[#allocation5 + $0xa8] sm:$0xff]  ;;  %p1837_p3 = scmp.ne.s32.totalorder %s2793_s17, %s1836_s8  ;;  %p2912_p11 = scmp.ne.s32.totalorder %s2870_s6, 0 }
  0x4f   : > { %350 = vmatpush1.msra.mxu0 %v299_v3  ;;  %1498 = vmatpush1.msra.mxu1 %v299_v3  ;;  %v291_v11 = vld [vmem:[#allocation5 + $0xa0] sm:$0xff]  ;;  %v290_v12 = vld [vmem:[#allocation5 + $0x98] sm:$0xff]  ;;  %v289_v13 = vld [vmem:[#allocation5 + $0x90] sm:$0xff]  ;;  %s1910_s9 = smov [#allocation7]  }
  0x50   : > { %351 = vmatprep.subr.mxu0 %v298_v4  ;;  %1467 = vmatprep.subr.mxu1 %v298_v4  ;;  %v288_v14 = vld [vmem:[#allocation5 + $0x88] sm:$0xff]  ;;  %v287_v15 = vld [vmem:[#allocation5 + $0x80] sm:$0xff]  ;;  %v286_v16 = vld [vmem:[#allocation5 + $0x78] sm:$0xff]  ;;  %p1838_p7 = pnand %p1837_p3, %p2912_p11  ;;  %s1840_s7 = sshll.u32 %s1910_s9, 4  ;;  %s1841_s7 = int_to_ptr.vmem [resolvable:$false] %s1840_s7 }
  0x51   : > { %352 = vmatpush1.msra.mxu0 %v297_v5  ;;  %1499 = vmatpush1.msra.mxu1 %v297_v5  ;;  %v285_v17 = vld [vmem:[#allocation5 + $0x70] sm:$0xff]  ;;  %v284_v18 = vld [vmem:[#allocation5 + $0x68] sm:$0xff]  ;;  %v283_v19 = vld [vmem:[#allocation5 + $0x60] sm:$0xff]  ;;  %s1842_s10 = scalar_lea.vmem %s1841_s7, 16384  ;;  %p1843_p10 = scmp.lt.s32.totalorder %s2793_s17, %s1841_s7 }
  0x52   : > { %353 = vmatprep.subr.mxu0 %v296_v6  ;;  %1468 = vmatprep.subr.mxu1 %v296_v6  ;;  %v282_v20 = vld [vmem:[#allocation5 + $0x58] sm:$0xff]  ;;  %v281_v21 = vld [vmem:[#allocation5 + $0x50] sm:$0xff]  ;;  %v280_v22 = vld [vmem:[#allocation5 + $0x48] sm:$0xff]  ;;  %p1839_p9 = pneg %p1838_p7  ;;  %p1844_p12 = scmp.lt.s32.totalorder %s1842_s10, %s1836_s8 }
  0x53   : > { %354 = vmatpush1.msra.mxu0 %v295_v7  ;;  %1500 = vmatpush1.msra.mxu1 %v295_v7  ;;  %v279_v23 = vld [vmem:[#allocation5 + $0x40] sm:$0xff]  ;;  %v278_v24 = vld [vmem:[#allocation5 + $0x38] sm:$0xff]  ;;  %v277_v25 = vld [vmem:[#allocation5 + $0x30] sm:$0xff] }
  0x54   : > { %355 = vmatprep.subr.mxu0 %v294_v8  ;;  %1469 = vmatprep.subr.mxu1 %v294_v8  ;;  %v276_v26 = vld [vmem:[#allocation5 + $0x28] sm:$0xff]  ;;  %v275_v27 = vld [vmem:[#allocation5 + $0x20] sm:$0xff]  ;;  %v274_v28 = vld [vmem:[#allocation5 + $0x18] sm:$0xff]  ;;  %p1845_p13 = por %p1844_p12, %p1843_p10 }
  0x55   : > { %356 = vmatpush1.msra.mxu0 %v293_v9  ;;  %1501 = vmatpush1.msra.mxu1 %v293_v9  ;;  %v273_v29 = vld [vmem:[#allocation5 + $0x10] sm:$0xff]  ;;  %v272_v30 = vld [vmem:[#allocation5 + $0x8] sm:$0xff]  ;;  %v271_v31 = vld [vmem:[#allocation5] sm:$0xff] }
  0x56   : > { %357 = vmatprep.subr.mxu0 %v292_v10  ;;  %1470 = vmatprep.subr.mxu1 %v292_v10  ;;  %v334_v32 = vld [vmem:[#allocation5 + $0x1f8] sm:$0xff]  ;;  %v333_v33 = vld [vmem:[#allocation5 + $0x1f0] sm:$0xff]  ;;  %v332_v34 = vld [vmem:[#allocation5 + $0x1e8] sm:$0xff]  ;;  %p1846_p0 = pnand %p1845_p13, %p1839_p9 }
  0x57   : > { %358 = vmatpush1.msra.mxu0 %v291_v11  ;;  %1502 = vmatpush1.msra.mxu1 %v291_v11  ;;  %v331_v35 = vld [vmem:[#allocation5 + $0x1e0] sm:$0xff]  ;;  %v330_v36 = vld [vmem:[#allocation5 + $0x1d8] sm:$0xff]  ;;  %v329_v37 = vld [vmem:[#allocation5 + $0x1d0] sm:$0xff] }
  0x58   : > { %359 = vmatprep.subr.mxu0 %v290_v12  ;;  %1471 = vmatprep.subr.mxu1 %v290_v12  ;;  %v328_v38 = vld [vmem:[#allocation5 + $0x1c8] sm:$0xff]  ;;  %v327_v39 = vld [vmem:[#allocation5 + $0x1c0] sm:$0xff]  ;;  %v326_v40 = vld [vmem:[#allocation5 + $0x1b8] sm:$0xff] }
  0x59   : > { %360 = vmatpush1.msra.mxu0 %v289_v13  ;;  %1503 = vmatpush1.msra.mxu1 %v289_v13  ;;  %v325_v41 = vld [vmem:[#allocation5 + $0x1b0] sm:$0xff]  ;;  %v324_v42 = vld [vmem:[#allocation5 + $0x1a8] sm:$0xff]  ;;  %v323_v43 = vld [vmem:[#allocation5 + $0x1a0] sm:$0xff] }
  0x5a   : > { %361 = vmatprep.subr.mxu0 %v288_v14  ;;  %1472 = vmatprep.subr.mxu1 %v288_v14  ;;  %v322_v44 = vld [vmem:[#allocation5 + $0x198] sm:$0xff]  ;;  %v321_v45 = vld [vmem:[#allocation5 + $0x190] sm:$0xff]  ;;  %v320_v46 = vld [vmem:[#allocation5 + $0x188] sm:$0xff] }
  0x5b   : > { %362 = vmatpush1.msra.mxu0 %v287_v15  ;;  %1504 = vmatpush1.msra.mxu1 %v287_v15  ;;  %v319_v47 = vld [vmem:[#allocation5 + $0x180] sm:$0xff]  ;;  %v318_v48 = vld [vmem:[#allocation5 + $0x178] sm:$0xff]  ;;  %v317_v49 = vld [vmem:[#allocation5 + $0x170] sm:$0xff] }
  0x5c   : > { %363 = vmatprep.subr.mxu0 %v286_v16  ;;  %1473 = vmatprep.subr.mxu1 %v286_v16  ;;  %v316_v50 = vld [vmem:[#allocation5 + $0x168] sm:$0xff]  ;;  %v315_v51 = vld [vmem:[#allocation5 + $0x160] sm:$0xff]  ;;  %v314_v52 = vld [vmem:[#allocation5 + $0x158] sm:$0xff] }
  0x5d   : > { %364 = vmatpush1.msra.mxu0 %v285_v17  ;;  %1505 = vmatpush1.msra.mxu1 %v285_v17  ;;  %v313_v53 = vld [vmem:[#allocation5 + $0x150] sm:$0xff]  ;;  %v312_v54 = vld [vmem:[#allocation5 + $0x148] sm:$0xff]  ;;  %v311_v55 = vld [vmem:[#allocation5 + $0x140] sm:$0xff] }
  0x5e   : > { %365 = vmatprep.subr.mxu0 %v284_v18  ;;  %1474 = vmatprep.subr.mxu1 %v284_v18  ;;  %v310_v56 = vld [vmem:[#allocation5 + $0x138] sm:$0xff]  ;;  %v309_v57 = vld [vmem:[#allocation5 + $0x130] sm:$0xff]  ;;  %v308_v58 = vld [vmem:[#allocation5 + $0x128] sm:$0xff] }
  0x5f   : > { %366 = vmatpush1.msra.mxu0 %v283_v19  ;;  %1506 = vmatpush1.msra.mxu1 %v283_v19  ;;  %v307_v59 = vld [vmem:[#allocation5 + $0x120] sm:$0xff]  ;;  %v306_v60 = vld [vmem:[#allocation5 + $0x118] sm:$0xff]  ;;  %v305_v61 = vld [vmem:[#allocation5 + $0x110] sm:$0xff] }
  0x60   : > { %367 = vmatprep.subr.mxu0 %v282_v20  ;;  %1475 = vmatprep.subr.mxu1 %v282_v20  ;;  %v304_v62 = vld [vmem:[#allocation5 + $0x108] sm:$0xff]  ;;  %v303_v63 = vld [vmem:[#allocation5 + $0x100] sm:$0xff]  ;;  %v210_v4 = vld [vmem:[%s2061_s23 + $0x18] sm:$0xff] }
  0x61   : > { %368 = vmatpush1.msra.mxu0 %v281_v21  ;;  %1507 = vmatpush1.msra.mxu1 %v281_v21  ;;  %v208_v0 = vld [vmem:[%s2061_s23 + $0x8] sm:$0xff]  ;;  %v207_v2 = vld [vmem:[%s2061_s23] sm:$0xff]  ;;  %v242_v5 = vld [vmem:[%s2061_s23 + $0x118] sm:$0xff] }
  0x62   : > { %369 = vmatprep.subr.mxu0 %v280_v22  ;;  %1476 = vmatprep.subr.mxu1 %v280_v22  ;;  %v240_v1 = vld [vmem:[%s2061_s23 + $0x108] sm:$0xff]  ;;  %v239_v3 = vld [vmem:[%s2061_s23 + $0x100] sm:$0xff]  ;;  %v209_v6 = vld [vmem:[%s2061_s23 + $0x10] sm:$0xff] }
  0x63   : > { %370 = vmatpush1.msra.mxu0 %v279_v23  ;;  %1508 = vmatpush1.msra.mxu1 %v279_v23  ;;  %v241_v7 = vld [vmem:[%s2061_s23 + $0x110] sm:$0xff]  ;;  %v212_v8 = vld [vmem:[%s2061_s23 + $0x28] sm:$0xff]  ;;  %v211_v10 = vld [vmem:[%s2061_s23 + $0x20] sm:$0xff] }
  0x64   : > { %371 = vmatprep.subr.mxu0 %v278_v24  ;;  %1477 = vmatprep.subr.mxu1 %v278_v24  ;;  %v244_v9 = vld [vmem:[%s2061_s23 + $0x128] sm:$0xff]  ;;  %v243_v11 = vld [vmem:[%s2061_s23 + $0x120] sm:$0xff]  ;;  %v214_v12 = vld [vmem:[%s2061_s23 + $0x38] sm:$0xff] }
  0x65   : > { %372 = vmatpush1.msra.mxu0 %v277_v25  ;;  %1509 = vmatpush1.msra.mxu1 %v277_v25  ;;  %v246_v13 = vld [vmem:[%s2061_s23 + $0x138] sm:$0xff]  ;;  %v213_v14 = vld [vmem:[%s2061_s23 + $0x30] sm:$0xff]  ;;  %v216_v16 = vld [vmem:[%s2061_s23 + $0x48] sm:$0xff] }
  0x66   : > { %373 = vmatprep.subr.mxu0 %v276_v26  ;;  %1478 = vmatprep.subr.mxu1 %v276_v26  ;;  %v245_v15 = vld [vmem:[%s2061_s23 + $0x130] sm:$0xff]  ;;  %v248_v17 = vld [vmem:[%s2061_s23 + $0x148] sm:$0xff]  ;;  %v215_v18 = vld [vmem:[%s2061_s23 + $0x40] sm:$0xff] }
  0x67   : > { %374 = vmatpush1.msra.mxu0 %v275_v27  ;;  %1510 = vmatpush1.msra.mxu1 %v275_v27  ;;  %v247_v19 = vld [vmem:[%s2061_s23 + $0x140] sm:$0xff]  ;;  %v218_v20 = vld [vmem:[%s2061_s23 + $0x58] sm:$0xff]  ;;  %v217_v22 = vld [vmem:[%s2061_s23 + $0x50] sm:$0xff] }
  0x68   : > { %375 = vmatprep.subr.mxu0 %v274_v28  ;;  %1479 = vmatprep.subr.mxu1 %v274_v28  ;;  %v250_v21 = vld [vmem:[%s2061_s23 + $0x158] sm:$0xff]  ;;  %v249_v23 = vld [vmem:[%s2061_s23 + $0x150] sm:$0xff]  ;;  %v220_v24 = vld [vmem:[%s2061_s23 + $0x68] sm:$0xff] }
  0x69   : > { %376 = vmatpush1.msra.mxu0 %v273_v29  ;;  %1511 = vmatpush1.msra.mxu1 %v273_v29  ;;  %v252_v25 = vld [vmem:[%s2061_s23 + $0x168] sm:$0xff]  ;;  %v219_v26 = vld [vmem:[%s2061_s23 + $0x60] sm:$0xff]  ;;  %v222_v28 = vld [vmem:[%s2061_s23 + $0x78] sm:$0xff] }
  0x6a   : > { %377 = vmatprep.subr.mxu0 %v272_v30  ;;  %1480 = vmatprep.subr.mxu1 %v272_v30  ;;  %v251_v27 = vld [vmem:[%s2061_s23 + $0x160] sm:$0xff]  ;;  %v254_v29 = vld [vmem:[%s2061_s23 + $0x178] sm:$0xff]  ;;  %v221_v30 = vld [vmem:[%s2061_s23 + $0x70] sm:$0xff] }
  0x6b   : > { %378 = vmatpush1.msra.mxu0 %v271_v31  ;;  %1512 = vmatpush1.msra.mxu1 %v271_v31  ;;  %v253_v31 = vld [vmem:[%s2061_s23 + $0x170] sm:$0xff] }
  0x6c   : > { %379 = vmatprep.subr.mxu0 %v334_v32  ;;  %1481 = vmatprep.subr.mxu1 %v334_v32  ;;  %v224_v32 = vld [vmem:[%s2061_s23 + $0x88] sm:$0xff] }
  0x6d   : > { %380 = vmatpush2.msra.mxu0 %v333_v33  ;;  %1513 = vmatpush2.msra.mxu1 %v333_v33  ;;  %v256_v33 = vld [vmem:[%s2061_s23 + $0x188] sm:$0xff] }
  0x6e   : > { %381 = vmatprep.subr.mxu0 %v332_v34  ;;  %1482 = vmatprep.subr.mxu1 %v332_v34  ;;  %v223_v34 = vld [vmem:[%s2061_s23 + $0x80] sm:$0xff] }
  0x6f   : > { %382 = vmatpush2.msra.mxu0 %v331_v35  ;;  %1514 = vmatpush2.msra.mxu1 %v331_v35  ;;  %v255_v35 = vld [vmem:[%s2061_s23 + $0x180] sm:$0xff] }
  0x70   : > { %383 = vmatprep.subr.mxu0 %v330_v36  ;;  %1483 = vmatprep.subr.mxu1 %v330_v36  ;;  %v226_v36 = vld [vmem:[%s2061_s23 + $0x98] sm:$0xff] }
  0x71   : > { %384 = vmatpush2.msra.mxu0 %v329_v37  ;;  %1515 = vmatpush2.msra.mxu1 %v329_v37  ;;  %v258_v37 = vld [vmem:[%s2061_s23 + $0x198] sm:$0xff] }
  0x72   : > { %385 = vmatprep.subr.mxu0 %v328_v38  ;;  %1484 = vmatprep.subr.mxu1 %v328_v38  ;;  %v225_v38 = vld [vmem:[%s2061_s23 + $0x90] sm:$0xff] }
  0x73   : > { %386 = vmatpush2.msra.mxu0 %v327_v39  ;;  %1516 = vmatpush2.msra.mxu1 %v327_v39  ;;  %v257_v39 = vld [vmem:[%s2061_s23 + $0x190] sm:$0xff] }
  0x74   : > { %387 = vmatprep.subr.mxu0 %v326_v40  ;;  %1485 = vmatprep.subr.mxu1 %v326_v40  ;;  %v228_v40 = vld [vmem:[%s2061_s23 + $0xa8] sm:$0xff] }
  0x75   : > { %388 = vmatpush2.msra.mxu0 %v325_v41  ;;  %1517 = vmatpush2.msra.mxu1 %v325_v41  ;;  %v260_v41 = vld [vmem:[%s2061_s23 + $0x1a8] sm:$0xff] }
  0x76   : > { %389 = vmatprep.subr.mxu0 %v324_v42  ;;  %1486 = vmatprep.subr.mxu1 %v324_v42  ;;  %v227_v42 = vld [vmem:[%s2061_s23 + $0xa0] sm:$0xff] }
  0x77   : > { %390 = vmatpush2.msra.mxu0 %v323_v43  ;;  %1518 = vmatpush2.msra.mxu1 %v323_v43  ;;  %v259_v43 = vld [vmem:[%s2061_s23 + $0x1a0] sm:$0xff] }
  0x78   : > { %391 = vmatprep.subr.mxu0 %v322_v44  ;;  %1487 = vmatprep.subr.mxu1 %v322_v44  ;;  %v230_v44 = vld [vmem:[%s2061_s23 + $0xb8] sm:$0xff] }
  0x79   : > { %392 = vmatpush2.msra.mxu0 %v321_v45  ;;  %1519 = vmatpush2.msra.mxu1 %v321_v45  ;;  %v262_v45 = vld [vmem:[%s2061_s23 + $0x1b8] sm:$0xff] }
  0x7a   : > { %393 = vmatprep.subr.mxu0 %v320_v46  ;;  %1488 = vmatprep.subr.mxu1 %v320_v46  ;;  %v229_v46 = vld [vmem:[%s2061_s23 + $0xb0] sm:$0xff] }
  0x7b   : > { %394 = vmatpush2.msra.mxu0 %v319_v47  ;;  %1520 = vmatpush2.msra.mxu1 %v319_v47  ;;  %v261_v47 = vld [vmem:[%s2061_s23 + $0x1b0] sm:$0xff] }
  0x7c   : > { %395 = vmatprep.subr.mxu0 %v318_v48  ;;  %1489 = vmatprep.subr.mxu1 %v318_v48  ;;  %v232_v48 = vld [vmem:[%s2061_s23 + $0xc8] sm:$0xff] }
  0x7d   : > { %396 = vmatpush2.msra.mxu0 %v317_v49  ;;  %1521 = vmatpush2.msra.mxu1 %v317_v49  ;;  %v264_v49 = vld [vmem:[%s2061_s23 + $0x1c8] sm:$0xff] }
  0x7e   : > { %397 = vmatprep.subr.mxu0 %v316_v50  ;;  %1490 = vmatprep.subr.mxu1 %v316_v50  ;;  %v231_v50 = vld [vmem:[%s2061_s23 + $0xc0] sm:$0xff] }
  0x7f   : > { %398 = vmatpush2.msra.mxu0 %v315_v51  ;;  %1522 = vmatpush2.msra.mxu1 %v315_v51  ;;  %v263_v51 = vld [vmem:[%s2061_s23 + $0x1c0] sm:$0xff] }
  0x80   : > { %399 = vmatprep.subr.mxu0 %v314_v52  ;;  %1491 = vmatprep.subr.mxu1 %v314_v52  ;;  %v234_v52 = vld [vmem:[%s2061_s23 + $0xd8] sm:$0xff] }
  0x81   : > { %400 = vmatpush2.msra.mxu0 %v313_v53  ;;  %1523 = vmatpush2.msra.mxu1 %v313_v53  ;;  %v266_v53 = vld [vmem:[%s2061_s23 + $0x1d8] sm:$0xff] }
  0x82   : > { %401 = vmatprep.subr.mxu0 %v312_v54  ;;  %1492 = vmatprep.subr.mxu1 %v312_v54  ;;  %v233_v54 = vld [vmem:[%s2061_s23 + $0xd0] sm:$0xff] }
  0x83   : > { %402 = vmatpush2.msra.mxu0 %v311_v55  ;;  %1524 = vmatpush2.msra.mxu1 %v311_v55  ;;  %v265_v55 = vld [vmem:[%s2061_s23 + $0x1d0] sm:$0xff] }
  0x84   : > { %403 = vmatprep.subr.mxu0 %v310_v56  ;;  %1493 = vmatprep.subr.mxu1 %v310_v56  ;;  %v236_v56 = vld [vmem:[%s2061_s23 + $0xe8] sm:$0xff] }
  0x85   : > { %404 = vmatpush2.msra.mxu0 %v309_v57  ;;  %1525 = vmatpush2.msra.mxu1 %v309_v57  ;;  %v268_v57 = vld [vmem:[%s2061_s23 + $0x1e8] sm:$0xff] }
  0x86   : > { %405 = vmatprep.subr.mxu0 %v308_v58  ;;  %1494 = vmatprep.subr.mxu1 %v308_v58  ;;  %v235_v58 = vld [vmem:[%s2061_s23 + $0xe0] sm:$0xff] }
  0x87   : > { %406 = vmatpush2.msra.mxu0 %v307_v59  ;;  %1526 = vmatpush2.msra.mxu1 %v307_v59  ;;  %v267_v59 = vld [vmem:[%s2061_s23 + $0x1e0] sm:$0xff] }
  0x88   : > { %407 = vmatprep.subr.mxu0 %v306_v60  ;;  %1495 = vmatprep.subr.mxu1 %v306_v60  ;;  %v238_v60 = vld [vmem:[%s2061_s23 + $0xf8] sm:$0xff] }
  0x89   : > { %408 = vmatpush2.msra.mxu0 %v305_v61  ;;  %1527 = vmatpush2.msra.mxu1 %v305_v61  ;;  %v270_v61 = vld [vmem:[%s2061_s23 + $0x1f8] sm:$0xff] }
  0x8a   : > { %409 = vmatprep.subr.mxu0 %v304_v62  ;;  %1496 = vmatprep.subr.mxu1 %v304_v62  ;;  %v237_v62 = vld [vmem:[%s2061_s23 + $0xf0] sm:$0xff] }
  0x8b   : > { %410 = vmatpush2.msra.mxu0 %v303_v63  ;;  %1528 = vmatpush2.msra.mxu1 %v303_v63  ;;  %v269_v63 = vld [vmem:[%s2061_s23 + $0x1f0] sm:$0xff] }
  0x8c   : > { %411 = vmatprep.mubr.f32.mxu0 %v208_v0  ;;  %507 = vmatprep.mubr.f32.mxu1 %v240_v1  ;;  %v337_v0 = vlaneseq }
  0x8d   : > { %412 = vmatmul.mubr.f32.vlgmr.msra.gmra.mxu0 %v207_v2  ;;  %508 = vmatmul.mubr.f32.vlgmr.msra.gmra.mxu1 %v239_v3  ;;  %v335_v3 = vld [vmem:[%s2841_s2] sm:$0x3] }
  0x8e   : > { %417 = vmatprep.mubr.f32.mxu0 %v210_v4  ;;  %513 = vmatprep.mubr.f32.mxu1 %v242_v5  ;;  %v338_v1 = vshrl.u32 %v337_v0, 7 }
  0x90   : > { %v339_v2 = vsub.s32 0, %v338_v1  ;;  %v343_v4 = vsub.s32 1, %v338_v1 }
  0x91   : > { %418 = vmatmul.mubr.f32.gmra.mxu0 %v209_v6  ;;  %514 = vmatmul.mubr.f32.gmra.mxu1 %v241_v7  ;;  %v2140_v6 = vand.u32 127, %v337_v0 }
  0x92   : > { %423 = vmatprep.mubr.f32.mxu0 %v212_v8  ;;  %519 = vmatprep.mubr.f32.mxu1 %v244_v9  ;;  %v2138_v5 = vrot.slane %v335_v3, %v339_v2  ;;  %v2142_v7 = vrot.slane %v335_v3, %v343_v4 }
  0x93   : > { %vm607_vm0 = vcmp.lt.s32.totalorder %v2140_v6, 8 }
  0x95   : > { %424 = vmatmul.mubr.f32.gmra.mxu0 %v211_v10  ;;  %520 = vmatmul.mubr.f32.gmra.mxu1 %v243_v11 }
  0x96   : > { %429 = vmatprep.mubr.f32.mxu0 %v214_v12  ;;  %525 = vmatprep.mubr.f32.mxu1 %v246_v13 }
  0x99   : > { %430 = vmatmul.mubr.f32.gmra.mxu0 %v213_v14  ;;  %526 = vmatmul.mubr.f32.gmra.mxu1 %v245_v15 }
  0x9a   : > { %435 = vmatprep.mubr.f32.mxu0 %v216_v16  ;;  %531 = vmatprep.mubr.f32.mxu1 %v248_v17 }
  0x9d   : > { %436 = vmatmul.mubr.f32.gmra.mxu0 %v215_v18  ;;  %532 = vmatmul.mubr.f32.gmra.mxu1 %v247_v19 }
  0x9e   : > { %441 = vmatprep.mubr.f32.mxu0 %v218_v20  ;;  %537 = vmatprep.mubr.f32.mxu1 %v250_v21 }
  0xa1   : > { %442 = vmatmul.mubr.f32.gmra.mxu0 %v217_v22  ;;  %538 = vmatmul.mubr.f32.gmra.mxu1 %v249_v23 }
  0xa2   : > { %447 = vmatprep.mubr.f32.mxu0 %v220_v24  ;;  %543 = vmatprep.mubr.f32.mxu1 %v252_v25 }
  0xa5   : > { %448 = vmatmul.mubr.f32.gmra.mxu0 %v219_v26  ;;  %544 = vmatmul.mubr.f32.gmra.mxu1 %v251_v27 }
  0xa6   : > { %453 = vmatprep.mubr.f32.mxu0 %v222_v28  ;;  %549 = vmatprep.mubr.f32.mxu1 %v254_v29 }
  0xa9   : > { %454 = vmatmul.mubr.f32.gmra.mxu0 %v221_v30  ;;  %550 = vmatmul.mubr.f32.gmra.mxu1 %v253_v31 }
  0xaa   : > { %459 = vmatprep.mubr.f32.mxu0 %v224_v32  ;;  %555 = vmatprep.mubr.f32.mxu1 %v256_v33 }
  0xad   : > { %460 = vmatmul.mubr.f32.gmra.mxu0 %v223_v34  ;;  %556 = vmatmul.mubr.f32.gmra.mxu1 %v255_v35 }
  0xae   : > { %465 = vmatprep.mubr.f32.mxu0 %v226_v36  ;;  %561 = vmatprep.mubr.f32.mxu1 %v258_v37 }
  0xb1   : > { %466 = vmatmul.mubr.f32.gmra.mxu0 %v225_v38  ;;  %562 = vmatmul.mubr.f32.gmra.mxu1 %v257_v39 }
  0xb2   : > { %471 = vmatprep.mubr.f32.mxu0 %v228_v40  ;;  %567 = vmatprep.mubr.f32.mxu1 %v260_v41 }
  0xb5   : > { %472 = vmatmul.mubr.f32.gmra.mxu0 %v227_v42  ;;  %568 = vmatmul.mubr.f32.gmra.mxu1 %v259_v43 }
  0xb6   : > { %477 = vmatprep.mubr.f32.mxu0 %v230_v44  ;;  %573 = vmatprep.mubr.f32.mxu1 %v262_v45 }
  0xb9   : > { %478 = vmatmul.mubr.f32.gmra.mxu0 %v229_v46  ;;  %574 = vmatmul.mubr.f32.gmra.mxu1 %v261_v47 }
  0xba   : > { %483 = vmatprep.mubr.f32.mxu0 %v232_v48  ;;  %579 = vmatprep.mubr.f32.mxu1 %v264_v49 }
  0xbd   : > { %484 = vmatmul.mubr.f32.gmra.mxu0 %v231_v50  ;;  %580 = vmatmul.mubr.f32.gmra.mxu1 %v263_v51 }
  0xbe   : > { %489 = vmatprep.mubr.f32.mxu0 %v234_v52  ;;  %585 = vmatprep.mubr.f32.mxu1 %v266_v53 }
  0xc1   : > { %490 = vmatmul.mubr.f32.gmra.mxu0 %v233_v54  ;;  %586 = vmatmul.mubr.f32.gmra.mxu1 %v265_v55 }
  0xc2   : > { %495 = vmatprep.mubr.f32.mxu0 %v236_v56  ;;  %591 = vmatprep.mubr.f32.mxu1 %v268_v57 }
  0xc5   : > { %496 = vmatmul.mubr.f32.gmra.mxu0 %v235_v58  ;;  %592 = vmatmul.mubr.f32.gmra.mxu1 %v267_v59 }
  0xc6   : > { %501 = vmatprep.mubr.f32.mxu0 %v238_v60  ;;  %597 = vmatprep.mubr.f32.mxu1 %v270_v61 }
  0xc9   : > { %502 = vmatmul.mubr.f32.gmra.mxu0 %v237_v62  ;;  %598 = vmatmul.mubr.f32.gmra.mxu1 %v269_v63 }
 0x14d   : > { %v413_v8 = vpop.f32.mrf.mxu0  ;;  %v509_v9 = vpop.f32.mrf.mxu1 }
 0x14e   : > { %v2145_v10 = vadd.f32 %v413_v8, %v2138_v5  ;;  %v2149_v11 = vadd.f32 %v509_v9, %v2138_v5 }
 0x14f   : > { %v415_v12 = vpop.f32.mrf.mxu0  ;;  %v511_v13 = vpop.f32.mrf.mxu1 }
 0x150   : > { %v416_v14 = vadd.f32 %v415_v12, %v2142_v7  ;;  %v512_v15 = vadd.f32 %v511_v13, %v2142_v7  ;;  %v2156_v18 = vsel %vm607_vm0, %v2145_v10, -inf  ;;  %v2168_v25 = vsel %vm607_vm0, %v2149_v11, -inf }
 0x151   : > { %v419_v16 = vpop.f32.mrf.mxu0  ;;  %v515_v17 = vpop.f32.mrf.mxu1  ;;  %674 = vmax.xlane.f32.xlu0 %v2156_v18 }
 0x152   : > { %v1154_v19 = vmul.f32 0.2, %v416_v14  ;;  %v1186_v20 = vmul.f32 0.2, %v512_v15  ;;  %v2159_v21 = vadd.f32 %v515_v17, %v2138_v5  ;;  %v2163_v22 = vadd.f32 %v419_v16, %v2138_v5 }
 0x153   : > { %v421_v23 = vpop.f32.mrf.mxu0  ;;  %v517_v24 = vpop.f32.mrf.mxu1 }
 0x154   : > { %1282 = vst [vmem:[%s2172_s28 + $0x8] sm:$0xff] %v1154_v19  ;;  %1314 = vst [vmem:[%s2172_s28 + $0x108] sm:$0xff] %v1186_v20  ;;  %v422_v26 = vadd.f32 %v421_v23, %v2142_v7  ;;  %v518_v27 = vadd.f32 %v517_v24, %v2142_v7  ;;  %v2181_v28 = vsel %vm607_vm0, %v2159_v21, -inf  ;;  %v2194_v36 = vsel %vm607_vm0, %v2163_v22, -inf }
 0x155   : > { %v425_v29 = vpop.f32.mrf.mxu0  ;;  %v521_v30 = vpop.f32.mrf.mxu1  ;;  %725 = vmax.xlane.f32.xlu1 %v2181_v28  ;;  %722 = vmax.xlane.f32.xlu0 %v2168_v25 }
 0x156   : > { %v1156_v31 = vmul.f32 0.2, %v422_v26  ;;  %v1188_v32 = vmul.f32 0.2, %v518_v27  ;;  %v2185_v33 = vadd.f32 %v425_v29, %v2138_v5  ;;  %v2189_v35 = vadd.f32 %v521_v30, %v2138_v5 }
 0x157   : > { %v427_v34 = vpop.f32.mrf.mxu0  ;;  %v523_v37 = vpop.f32.mrf.mxu1 }
 0x158   : > { %1284 = vst [vmem:[%s2172_s28 + $0x18] sm:$0xff] %v1156_v31  ;;  %1316 = vst [vmem:[%s2172_s28 + $0x118] sm:$0xff] %v1188_v32  ;;  %v428_v38 = vadd.f32 %v427_v34, %v2142_v7  ;;  %v2202_v39 = vsel %vm607_vm0, %v2185_v33, -inf  ;;  %v524_v41 = vadd.f32 %v523_v37, %v2142_v7  ;;  %v2216_v48 = vsel %vm607_vm0, %v2189_v35, -inf }
 0x159   : > { %v431_v40 = vpop.f32.mrf.mxu0  ;;  %v527_v42 = vpop.f32.mrf.mxu1  ;;  %680 = vmax.xlane.f32.xlu1 %v2202_v39  ;;  %677 = vmax.xlane.f32.xlu0 %v2194_v36 }
 0x15a   : > { %v1158_v43 = vmul.f32 0.2, %v428_v38  ;;  %v2206_v44 = vadd.f32 %v431_v40, %v2138_v5  ;;  %v1190_v46 = vmul.f32 0.2, %v524_v41  ;;  %v2211_v47 = vadd.f32 %v527_v42, %v2138_v5 }
 0x15b   : > { %v433_v45 = vpop.f32.mrf.mxu0  ;;  %v529_v49 = vpop.f32.mrf.mxu1 }
 0x15c   : > { %1286 = vst [vmem:[%s2172_s28 + $0x28] sm:$0xff] %v1158_v43  ;;  %v434_v50 = vadd.f32 %v433_v45, %v2142_v7  ;;  %v2223_v51 = vsel %vm607_vm0, %v2206_v44, -inf  ;;  %1318 = vst [vmem:[%s2172_s28 + $0x128] sm:$0xff] %v1190_v46  ;;  %v530_v53 = vadd.f32 %v529_v49, %v2142_v7  ;;  %v2238_v60 = vsel %vm607_vm0, %v2211_v47, -inf }
 0x15d   : > { %v437_v52 = vpop.f32.mrf.mxu0  ;;  %v533_v54 = vpop.f32.mrf.mxu1  ;;  %683 = vmax.xlane.f32.xlu1 %v2223_v51  ;;  %728 = vmax.xlane.f32.xlu0 %v2216_v48 }
 0x15e   : > { %v1160_v55 = vmul.f32 0.2, %v434_v50  ;;  %v2228_v56 = vadd.f32 %v437_v52, %v2138_v5  ;;  %v1192_v58 = vmul.f32 0.2, %v530_v53  ;;  %v2233_v59 = vadd.f32 %v533_v54, %v2138_v5 }
 0x15f   : > { %v439_v57 = vpop.f32.mrf.mxu0  ;;  %v535_v61 = vpop.f32.mrf.mxu1 }
 0x160   : > { %1288 = vst [vmem:[%s2172_s28 + $0x38] sm:$0xff] %v1160_v55  ;;  %v440_v62 = vadd.f32 %v439_v57, %v2142_v7  ;;  %v2245_v63 = vsel %vm607_vm0, %v2228_v56, -inf  ;;  %1320 = vst [vmem:[%s2172_s28 + $0x138] sm:$0xff] %v1192_v58  ;;  %v536_v1 = vadd.f32 %v535_v61, %v2142_v7  ;;  %v2260_v13 = vsel %vm607_vm0, %v2233_v59, -inf }
 0x161   : > { %v443_v0 = vpop.f32.mrf.mxu0  ;;  %v539_v2 = vpop.f32.mrf.mxu1  ;;  %731 = vmax.xlane.f32.xlu1 %v2238_v60  ;;  %686 = vmax.xlane.f32.xlu0 %v2245_v63 }
 0x162   : > { %v1162_v3 = vmul.f32 0.2, %v440_v62  ;;  %v2250_v4 = vadd.f32 %v443_v0, %v2138_v5  ;;  %v1194_v9 = vmul.f32 0.2, %v536_v1  ;;  %v2255_v12 = vadd.f32 %v539_v2, %v2138_v5 }
 0x163   : > { %v445_v8 = vpop.f32.mrf.mxu0  ;;  %v541_v14 = vpop.f32.mrf.mxu1 }
 0x164   : > { %1290 = vst [vmem:[%s2172_s28 + $0x48] sm:$0xff] %v1162_v3  ;;  %v446_v15 = vadd.f32 %v445_v8, %v2142_v7  ;;  %v2267_v16 = vsel %vm607_vm0, %v2250_v4, -inf  ;;  %1322 = vst [vmem:[%s2172_s28 + $0x148] sm:$0xff] %v1194_v9  ;;  %v542_v19 = vadd.f32 %v541_v14, %v2142_v7  ;;  %v2282_v30 = vsel %vm607_vm0, %v2255_v12, -inf }
 0x165   : > { %v449_v17 = vpop.f32.mrf.mxu0  ;;  %v545_v20 = vpop.f32.mrf.mxu1  ;;  %689 = vmax.xlane.f32.xlu1 %v2267_v16  ;;  %734 = vmax.xlane.f32.xlu0 %v2260_v13 }
 0x166   : > { %v1164_v23 = vmul.f32 0.2, %v446_v15  ;;  %v2272_v24 = vadd.f32 %v449_v17, %v2138_v5  ;;  %v1196_v27 = vmul.f32 0.2, %v542_v19  ;;  %v2277_v29 = vadd.f32 %v545_v20, %v2138_v5 }
 0x167   : > { %v451_v26 = vpop.f32.mrf.mxu0  ;;  %v547_v31 = vpop.f32.mrf.mxu1 }
 0x168   : > { %1292 = vst [vmem:[%s2172_s28 + $0x58] sm:$0xff] %v1164_v23  ;;  %v452_v32 = vadd.f32 %v451_v26, %v2142_v7  ;;  %v2289_v34 = vsel %vm607_vm0, %v2272_v24, -inf  ;;  %1324 = vst [vmem:[%s2172_s28 + $0x158] sm:$0xff] %v1196_v27  ;;  %v548_v38 = vadd.f32 %v547_v31, %v2142_v7  ;;  %v2304_v49 = vsel %vm607_vm0, %v2277_v29, -inf }
 0x169   : > { %v455_v37 = vpop.f32.mrf.mxu0  ;;  %v551_v40 = vpop.f32.mrf.mxu1  ;;  %737 = vmax.xlane.f32.xlu1 %v2282_v30  ;;  %692 = vmax.xlane.f32.xlu0 %v2289_v34 }
 0x16a   : > { %v1166_v41 = vmul.f32 0.2, %v452_v32  ;;  %v2294_v42 = vadd.f32 %v455_v37, %v2138_v5  ;;  %v1198_v45 = vmul.f32 0.2, %v548_v38  ;;  %v2299_v46 = vadd.f32 %v551_v40, %v2138_v5 }
 0x16b   : > { %v457_v43 = vpop.f32.mrf.mxu0  ;;  %v553_v50 = vpop.f32.mrf.mxu1 }
 0x16c   : > { %2876 = vst [vmem:[#allocation11_spill] sm:$0xff] %v2294_v42  ;;  %2877 = vst [vmem:[#allocation12_spill] sm:$0xff] %v2299_v46  ;;  %v458_v52 = vadd.f32 %v457_v43, %v2142_v7  ;;  %v2311_v53 = vsel %vm607_vm0, %v2294_v42, -inf  ;;  %v554_v55 = vadd.f32 %v553_v50, %v2142_v7  ;;  %v2326_v2 = vsel %vm607_vm0, %v2299_v46, -inf }
 0x16d   : > { %1294 = vst [vmem:[%s2172_s28 + $0x68] sm:$0xff] %v1166_v41  ;;  %1326 = vst [vmem:[%s2172_s28 + $0x168] sm:$0xff] %v1198_v45  ;;  %v461_v54 = vpop.f32.mrf.mxu0  ;;  %v557_v57 = vpop.f32.mrf.mxu1  ;;  %695 = vmax.xlane.f32.xlu1 %v2311_v53  ;;  %740 = vmax.xlane.f32.xlu0 %v2304_v49 }
 0x16e   : > { %v1168_v58 = vmul.f32 0.2, %v458_v52  ;;  %v2316_v61 = vadd.f32 %v461_v54, %v2138_v5  ;;  %v1200_v0 = vmul.f32 0.2, %v554_v55  ;;  %v2321_v1 = vadd.f32 %v557_v57, %v2138_v5 }
 0x16f   : > { %v463_v62 = vpop.f32.mrf.mxu0  ;;  %v559_v3 = vpop.f32.mrf.mxu1 }
 0x170   : > { %2878 = vst [vmem:[#allocation13_spill] sm:$0xff] %v2316_v61  ;;  %2879 = vst [vmem:[#allocation14_spill] sm:$0xff] %v2321_v1  ;;  %v464_v8 = vadd.f32 %v463_v62, %v2142_v7  ;;  %v2333_v9 = vsel %vm607_vm0, %v2316_v61, -inf  ;;  %v560_v15 = vadd.f32 %v559_v3, %v2142_v7  ;;  %v2348_v31 = vsel %vm607_vm0, %v2321_v1, -inf }
 0x171   : > { %1296 = vst [vmem:[%s2172_s28 + $0x78] sm:$0xff] %v1168_v58  ;;  %1328 = vst [vmem:[%s2172_s28 + $0x178] sm:$0xff] %v1200_v0  ;;  %v467_v14 = vpop.f32.mrf.mxu0  ;;  %v563_v17 = vpop.f32.mrf.mxu1  ;;  %743 = vmax.xlane.f32.xlu1 %v2326_v2  ;;  %698 = vmax.xlane.f32.xlu0 %v2333_v9 }
 0x172   : > { %v1170_v19 = vmul.f32 0.2, %v464_v8  ;;  %v2338_v20 = vadd.f32 %v467_v14, %v2138_v5  ;;  %v1202_v26 = vmul.f32 0.2, %v560_v15  ;;  %v2343_v27 = vadd.f32 %v563_v17, %v2138_v5 }
 0x173   : > { %v469_v23 = vpop.f32.mrf.mxu0  ;;  %v565_v32 = vpop.f32.mrf.mxu1 }
 0x174   : > { %2880 = vst [vmem:[#allocation15_spill] sm:$0xff] %v2338_v20  ;;  %2881 = vst [vmem:[#allocation16_spill] sm:$0xff] %v2343_v27  ;;  %v470_v37 = vadd.f32 %v469_v23, %v2142_v7  ;;  %v2355_v38 = vsel %vm607_vm0, %v2338_v20, -inf  ;;  %v566_v41 = vadd.f32 %v565_v32, %v2142_v7  ;;  %v2370_v57 = vsel %vm607_vm0, %v2343_v27, -inf }
 0x175   : > { %1298 = vst [vmem:[%s2172_s28 + $0x88] sm:$0xff] %v1170_v19  ;;  %1330 = vst [vmem:[%s2172_s28 + $0x188] sm:$0xff] %v1202_v26  ;;  %v473_v40 = vpop.f32.mrf.mxu0  ;;  %v569_v43 = vpop.f32.mrf.mxu1  ;;  %701 = vmax.xlane.f32.xlu1 %v2355_v38  ;;  %746 = vmax.xlane.f32.xlu0 %v2348_v31 }
 0x176   : > { %v1172_v45 = vmul.f32 0.2, %v470_v37  ;;  %v2360_v50 = vadd.f32 %v473_v40, %v2138_v5  ;;  %v1204_v54 = vmul.f32 0.2, %v566_v41  ;;  %v2365_v55 = vadd.f32 %v569_v43, %v2138_v5 }
 0x177   : > { %v475_v52 = vpop.f32.mrf.mxu0  ;;  %v571_v58 = vpop.f32.mrf.mxu1 }
 0x178   : > { %2882 = vst [vmem:[#allocation17_spill] sm:$0xff] %v2360_v50  ;;  %2883 = vst [vmem:[#allocation18_spill] sm:$0xff] %v2365_v55  ;;  %v476_v62 = vadd.f32 %v475_v52, %v2142_v7  ;;  %v2377_v0 = vsel %vm607_vm0, %v2360_v50, -inf  ;;  %v572_v8 = vadd.f32 %v571_v58, %v2142_v7  ;;  %v2392_v32 = vsel %vm607_vm0, %v2365_v55, -inf }
 0x179   : > { %1300 = vst [vmem:[%s2172_s28 + $0x98] sm:$0xff] %v1172_v45  ;;  %1332 = vst [vmem:[%s2172_s28 + $0x198] sm:$0xff] %v1204_v54  ;;  %v479_v3 = vpop.f32.mrf.mxu0  ;;  %v575_v14 = vpop.f32.mrf.mxu1  ;;  %749 = vmax.xlane.f32.xlu1 %v2370_v57  ;;  %704 = vmax.xlane.f32.xlu0 %v2377_v0 }
 0x17a   : > { %v1174_v15 = vmul.f32 0.2, %v476_v62  ;;  %v2382_v17 = vadd.f32 %v479_v3, %v2138_v5  ;;  %v1206_v23 = vmul.f32 0.2, %v572_v8  ;;  %v2387_v26 = vadd.f32 %v575_v14, %v2138_v5 }
 0x17b   : > { %v481_v19 = vpop.f32.mrf.mxu0  ;;  %v577_v37 = vpop.f32.mrf.mxu1 }
 0x17c   : > { %2884 = vst [vmem:[#allocation19_spill] sm:$0xff] %v2382_v17  ;;  %2885 = vst [vmem:[#allocation20_spill] sm:$0xff] %v2387_v26  ;;  %v482_v40 = vadd.f32 %v481_v19, %v2142_v7  ;;  %v2399_v41 = vsel %vm607_vm0, %v2382_v17, -inf  ;;  %v578_v45 = vadd.f32 %v577_v37, %v2142_v7  ;;  %v2414_v14 = vsel %vm607_vm0, %v2387_v26, -inf }
 0x17d   : > { %1302 = vst [vmem:[%s2172_s28 + $0xa8] sm:$0xff] %v1174_v15  ;;  %1334 = vst [vmem:[%s2172_s28 + $0x1a8] sm:$0xff] %v1206_v23  ;;  %v485_v43 = vpop.f32.mrf.mxu0  ;;  %v581_v52 = vpop.f32.mrf.mxu1  ;;  %707 = vmax.xlane.f32.xlu1 %v2399_v41  ;;  %752 = vmax.xlane.f32.xlu0 %v2392_v32 }
 0x17e   : > { %v1176_v54 = vmul.f32 0.2, %v482_v40  ;;  %v2404_v58 = vadd.f32 %v485_v43, %v2138_v5  ;;  %v1208_v3 = vmul.f32 0.2, %v578_v45  ;;  %v2409_v8 = vadd.f32 %v581_v52, %v2138_v5 }
 0x17f   : > { %v487_v62 = vpop.f32.mrf.mxu0  ;;  %v583_v15 = vpop.f32.mrf.mxu1 }
 0x180   : > { %2886 = vst [vmem:[#allocation21_spill] sm:$0xff] %v2404_v58  ;;  %2887 = vst [vmem:[#allocation22_spill] sm:$0xff] %v2409_v8  ;;  %v488_v19 = vadd.f32 %v487_v62, %v2142_v7  ;;  %v2421_v23 = vsel %vm607_vm0, %v2404_v58, -inf  ;;  %v584_v40 = vadd.f32 %v583_v15, %v2142_v7 }
 0x181   : > { %1304 = vst [vmem:[%s2172_s28 + $0xb8] sm:$0xff] %v1176_v54  ;;  %1336 = vst [vmem:[%s2172_s28 + $0x1b8] sm:$0xff] %v1208_v3  ;;  %v491_v37 = vpop.f32.mrf.mxu0  ;;  %v587_v43 = vpop.f32.mrf.mxu1  ;;  %755 = vmax.xlane.f32.xlu1 %v2414_v14  ;;  %710 = vmax.xlane.f32.xlu0 %v2421_v23  ;;  %v2436_v3 = vsel %vm607_vm0, %v2409_v8, -inf }
 0x182   : > { %v1178_v45 = vmul.f32 0.2, %v488_v19  ;;  %v2426_v52 = vadd.f32 %v491_v37, %v2138_v5  ;;  %v1210_v62 = vmul.f32 0.2, %v584_v40  ;;  %v2431_v26 = vadd.f32 %v587_v43, %v2138_v5 }
 0x183   : > { %v493_v54 = vpop.f32.mrf.mxu0  ;;  %v589_v15 = vpop.f32.mrf.mxu1 }
 0x184   : > { %2888 = vst [vmem:[#allocation23_spill] sm:$0xff] %v2426_v52  ;;  %2889 = vst [vmem:[#allocation24_spill] sm:$0xff] %v2431_v26  ;;  %v494_v19 = vadd.f32 %v493_v54, %v2142_v7  ;;  %v2443_v37 = vsel %vm607_vm0, %v2426_v52, -inf  ;;  %v590_v43 = vadd.f32 %v589_v15, %v2142_v7 }
 0x185   : > { %1306 = vst [vmem:[%s2172_s28 + $0xc8] sm:$0xff] %v1178_v45  ;;  %1338 = vst [vmem:[%s2172_s28 + $0x1c8] sm:$0xff] %v1210_v62  ;;  %v497_v40 = vpop.f32.mrf.mxu0  ;;  %v593_v58 = vpop.f32.mrf.mxu1  ;;  %713 = vmax.xlane.f32.xlu1 %v2443_v37  ;;  %758 = vmax.xlane.f32.xlu0 %v2436_v3  ;;  %v2458_v62 = vsel %vm607_vm0, %v2431_v26, -inf }
 0x186   : > { %v1180_v17 = vmul.f32 0.2, %v494_v19  ;;  %v2448_v8 = vadd.f32 %v497_v40, %v2138_v5  ;;  %v1212_v54 = vmul.f32 0.2, %v590_v43  ;;  %v2453_v55 = vadd.f32 %v593_v58, %v2138_v5 }
 0x187   : > { %v499_v45 = vpop.f32.mrf.mxu0  ;;  %v595_v15 = vpop.f32.mrf.mxu1 }
 0x188   : > { %2890 = vst [vmem:[#allocation25_spill] sm:$0xff] %v2448_v8  ;;  %2891 = vst [vmem:[#allocation26_spill] sm:$0xff] %v2453_v55  ;;  %v500_v19 = vadd.f32 %v499_v45, %v2142_v7  ;;  %v2465_v40 = vsel %vm607_vm0, %v2448_v8, -inf  ;;  %v596_v58 = vadd.f32 %v595_v15, %v2142_v7 }
 0x189   : > { %1308 = vst [vmem:[%s2172_s28 + $0xd8] sm:$0xff] %v1180_v17  ;;  %1340 = vst [vmem:[%s2172_s28 + $0x1d8] sm:$0xff] %v1212_v54  ;;  %v503_v43 = vpop.f32.mrf.mxu0  ;;  %v599_v52 = vpop.f32.mrf.mxu1  ;;  %761 = vmax.xlane.f32.xlu1 %v2458_v62  ;;  %716 = vmax.xlane.f32.xlu0 %v2465_v40  ;;  %v2480_v54 = vsel %vm607_vm0, %v2453_v55, -inf }
 0x18a   : > { %v1182_v27 = vmul.f32 0.2, %v500_v19  ;;  %v2470_v26 = vadd.f32 %v503_v43, %v2138_v5  ;;  %v1214_v17 = vmul.f32 0.2, %v596_v58  ;;  %v2475_v8 = vadd.f32 %v599_v52, %v2138_v5 }
 0x18b   : > { %v505_v45 = vpop.f32.mrf.mxu0  ;;  %v601_v15 = vpop.f32.mrf.mxu1 }
 0x18c   : > { %2892 = vst [vmem:[#allocation27_spill] sm:$0xff] %v2470_v26  ;;  %2893 = vst [vmem:[#allocation28_spill] sm:$0xff] %v2475_v8  ;;  %v506_v19 = vadd.f32 %v505_v45, %v2142_v7  ;;  %v2487_v43 = vsel %vm607_vm0, %v2470_v26, -inf  ;;  %v602_v58 = vadd.f32 %v601_v15, %v2142_v7 }
 0x18d   : > { %1310 = vst [vmem:[%s2172_s28 + $0xe8] sm:$0xff] %v1182_v27  ;;  %1342 = vst [vmem:[%s2172_s28 + $0x1e8] sm:$0xff] %v1214_v17  ;;  %719 = vmax.xlane.f32.xlu1 %v2487_v43  ;;  %764 = vmax.xlane.f32.xlu0 %v2480_v54  ;;  %v2496_v27 = vsel %vm607_vm0, %v2475_v8, -inf }
 0x18e   : > { %v1184_v50 = vmul.f32 0.2, %v506_v19  ;;  %v1216_v5 = vmul.f32 0.2, %v602_v58 }
 0x190   : > { %1312 = vst [vmem:[%s2172_s28 + $0xf8] sm:$0xff] %v1184_v50  ;;  %1344 = vst [vmem:[%s2172_s28 + $0x1f8] sm:$0xff] %v1216_v5 }
 0x191   : > { %767 = vmax.xlane.f32.xlu1 %v2496_v27 }
 0x1da   : > { %v675_v52 = vpop.xlane.xlu0 %674 }
 0x1db   : > { %v769_v17 = vsub.f32 %v2156_v18, %v675_v52  ;;  %v770_v45 = vsub.f32 -inf, %v675_v52 }
 0x1dd   : > { %v833_v7 = vmul.f32 1.442695, %v769_v17  ;;  %v835_v15 = vmul.f32 1.442695, %v770_v45 }
 0x1de   : > { %v726_v19 = vpop.xlane.xlu1 %725  ;;  %v723_v26 = vpop.xlane.xlu0 %722 }
 0x1df   : > { %1590 = vpow2.f32 %v833_v7  ;;  %v803_v58 = vsub.f32 %v2181_v28, %v726_v19  ;;  %v804_v55 = vsub.f32 -inf, %v726_v19  ;;  %v801_v20 = vsub.f32 %v2168_v25, %v723_v26 }
 0x1e0   : > { %1592 = vpow2.f32 %v835_v15  ;;  %v802_v8 = vsub.f32 -inf, %v723_v26 }
 0x1e1   : > { %v901_v50 = vmul.f32 1.442695, %v803_v58  ;;  %v903_v5 = vmul.f32 1.442695, %v804_v55  ;;  %v897_v1 = vmul.f32 1.442695, %v801_v20 }
 0x1e2   : > { %v899_v46 = vmul.f32 1.442695, %v802_v8  ;;  %v681_v61 = vpop.xlane.xlu1 %680  ;;  %v678_v42 = vpop.xlane.xlu0 %677 }
 0x1e3   : > { %1594 = vpow2.f32 %v901_v50  ;;  %v773_v18 = vsub.f32 %v2202_v39, %v681_v61  ;;  %v774_v52 = vsub.f32 -inf, %v681_v61  ;;  %v771_v17 = vsub.f32 %v2194_v36, %v678_v42 }
 0x1e4   : > { %1596 = vpow2.f32 %v903_v5  ;;  %v772_v45 = vsub.f32 -inf, %v678_v42 }
 0x1e5   : > { %1598 = vpow2.f32 %v897_v1  ;;  %v841_v28 = vmul.f32 1.442695, %v773_v18  ;;  %v843_v7 = vmul.f32 1.442695, %v774_v52  ;;  %v837_v25 = vmul.f32 1.442695, %v771_v17 }
 0x1e6   : > { %1600 = vpow2.f32 %v899_v46  ;;  %v839_v26 = vmul.f32 1.442695, %v772_v45  ;;  %v684_v15 = vpop.xlane.xlu1 %683  ;;  %v729_v55 = vpop.xlane.xlu0 %728 }
 0x1e7   : > { %1602 = vpow2.f32 %v841_v28  ;;  %v775_v20 = vsub.f32 %v2223_v51, %v684_v15  ;;  %v776_v8 = vsub.f32 -inf, %v684_v15  ;;  %v805_v19 = vsub.f32 %v2216_v48, %v729_v55 }
 0x1e8   : > { %1604 = vpow2.f32 %v843_v7  ;;  %v806_v39 = vsub.f32 -inf, %v729_v55 }
 0x1e9   : > { %1606 = vpow2.f32 %v837_v25  ;;  %v845_v36 = vmul.f32 1.442695, %v775_v20  ;;  %v847_v61 = vmul.f32 1.442695, %v776_v8  ;;  %v905_v42 = vmul.f32 1.442695, %v805_v19 }
 0x1ea   : > { %1608 = vpow2.f32 %v839_v26  ;;  %v907_v1 = vmul.f32 1.442695, %v806_v39  ;;  %v732_v58 = vpop.xlane.xlu1 %731  ;;  %v687_v50 = vpop.xlane.xlu0 %686 }
 0x1eb   : > { %1610 = vpow2.f32 %v845_v36  ;;  %v807_v46 = vsub.f32 %v2238_v60, %v732_v58  ;;  %v808_v5 = vsub.f32 -inf, %v732_v58  ;;  %v777_v18 = vsub.f32 %v2245_v63, %v687_v50 }
 0x1ec   : > { %v2510_v51 = vpop.eup %1590  ;;  %1612 = vpow2.f32 %v847_v61  ;;  %v778_v48 = vsub.f32 -inf, %v687_v50 }
 0x1ed   : > { %v1593_v52 = vpop.eup %1592  ;;  %1614 = vpow2.f32 %v905_v42  ;;  %v909_v17 = vmul.f32 1.442695, %v807_v46  ;;  %v911_v45 = vmul.f32 1.442695, %v808_v5  ;;  %v849_v28 = vmul.f32 1.442695, %v777_v18 }
 0x1ee   : > { %1616 = vpow2.f32 %v907_v1  ;;  %v851_v7 = vmul.f32 1.442695, %v778_v48  ;;  %v690_v25 = vpop.xlane.xlu1 %689  ;;  %v735_v26 = vpop.xlane.xlu0 %734  ;;  %v961_v15 = vadd.f32 %v1593_v52, %v2510_v51 }
 0x1ef   : > { %1618 = vpow2.f32 %v909_v17  ;;  %v779_v60 = vsub.f32 %v2267_v16, %v690_v25  ;;  %v780_v55 = vsub.f32 -inf, %v690_v25  ;;  %v809_v63 = vsub.f32 %v2260_v13, %v735_v26 }
 0x1f0   : > { %v2515_v20 = vpop.eup %1594  ;;  %1620 = vpow2.f32 %v911_v45  ;;  %v810_v8 = vsub.f32 -inf, %v735_v26  ;;  %962 = vadd.xlane.f32.xlu0 %v961_v15 }
 0x1f1   : > { %v1597_v19 = vpop.eup %1596  ;;  %1622 = vpow2.f32 %v849_v28  ;;  %v853_v39 = vmul.f32 1.442695, %v779_v60  ;;  %v855_v36 = vmul.f32 1.442695, %v780_v55  ;;  %v913_v61 = vmul.f32 1.442695, %v809_v63 }
 0x1f2   : > { %v2517_v42 = vpop.eup %1598  ;;  %1624 = vpow2.f32 %v851_v7  ;;  %v915_v1 = vmul.f32 1.442695, %v810_v8  ;;  %v738_v58 = vpop.xlane.xlu1 %737 }
 0x1f3   : > { %v693_v50 = vpop.xlane.xlu0 %692  ;;  %v1601_v16 = vpop.eup %1600  ;;  %1626 = vpow2.f32 %v853_v39  ;;  %v811_v13 = vsub.f32 %v2282_v30, %v738_v58  ;;  %v812_v46 = vsub.f32 -inf, %v738_v58 }
 0x1f4   : > { %v781_v5 = vsub.f32 %v2289_v34, %v693_v50  ;;  %v2521_v18 = vpop.eup %1602  ;;  %1628 = vpow2.f32 %v855_v36  ;;  %v782_v48 = vsub.f32 -inf, %v693_v50  ;;  %v1009_v52 = vadd.f32 %v1601_v16, %v2517_v42 }
 0x1f5   : > { %v1605_v17 = vpop.eup %1604  ;;  %1630 = vpow2.f32 %v913_v61  ;;  %v917_v45 = vmul.f32 1.442695, %v811_v13  ;;  %v919_v28 = vmul.f32 1.442695, %v812_v46 }
 0x1f6   : > { %v857_v7 = vmul.f32 1.442695, %v781_v5  ;;  %v2524_v25 = vpop.eup %1606  ;;  %1632 = vpow2.f32 %v915_v1  ;;  %v859_v26 = vmul.f32 1.442695, %v782_v48  ;;  %1010 = vadd.xlane.f32.xlu0 %v1009_v52  ;;  %v696_v30 = vpop.xlane.xlu1 %695  ;;  %v967_v34 = vadd.f32 %v1605_v17, %v2521_v18 }
 0x1f7   : > { %v741_v15 = vpop.xlane.xlu0 %740  ;;  %v1609_v60 = vpop.eup %1608  ;;  %1634 = vpow2.f32 %v917_v45  ;;  %v783_v55 = vsub.f32 %v2311_v53, %v696_v30  ;;  %v784_v63 = vsub.f32 -inf, %v696_v30 }
 0x1f8   : > { %v813_v8 = vsub.f32 %v2304_v49, %v741_v15  ;;  %v2529_v39 = vpop.eup %1610  ;;  %1636 = vpow2.f32 %v919_v28  ;;  %v814_v36 = vsub.f32 -inf, %v741_v15  ;;  %v964_v61 = vadd.f32 %v1609_v60, %v2524_v25 }
 0x1f9   : > { %v1613_v1 = vpop.eup %1612  ;;  %1638 = vpow2.f32 %v857_v7  ;;  %v861_v58 = vmul.f32 1.442695, %v783_v55  ;;  %v863_v50 = vmul.f32 1.442695, %v784_v63  ;;  %v1012_v7 = vadd.f32 %v1597_v19, %v2515_v20 }
 0x1fa   : > { %v921_v16 = vmul.f32 1.442695, %v813_v8  ;;  %v2532_v13 = vpop.eup %1614  ;;  %1640 = vpow2.f32 %v859_v26  ;;  %v923_v46 = vmul.f32 1.442695, %v814_v36  ;;  %968 = vadd.xlane.f32.xlu0 %v967_v34  ;;  %965 = vadd.xlane.f32.xlu1 %v964_v61  ;;  %v744_v53 = vpop.xlane.xlu1 %743 }
 0x1fb   : > { %v699_v5 = vpop.xlane.xlu0 %698  ;;  %v1617_v49 = vpop.eup %1616  ;;  %1642 = vpow2.f32 %v861_v58  ;;  %v815_v48 = vsub.f32 %v2326_v2, %v744_v53  ;;  %v816_v52 = vsub.f32 -inf, %v744_v53 }
 0x1fc   : > { %v785_v17 = vsub.f32 %v2333_v9, %v699_v5  ;;  %v2536_v45 = vpop.eup %1618  ;;  %1644 = vpow2.f32 %v863_v50  ;;  %v786_v28 = vsub.f32 -inf, %v699_v5  ;;  %v1015_v26 = vadd.f32 %v1617_v49, %v2532_v13 }
 0x1fd   : > { %v1621_v30 = vpop.eup %1620  ;;  %1646 = vpow2.f32 %v921_v16  ;;  %v925_v15 = vmul.f32 1.442695, %v815_v48  ;;  %v927_v34 = vmul.f32 1.442695, %v816_v52  ;;  %v970_v16 = vadd.f32 %v1613_v1, %v2529_v39 }
 0x1fe   : > { %v865_v60 = vmul.f32 1.442695, %v785_v17  ;;  %v2540_v55 = vpop.eup %1622  ;;  %1648 = vpow2.f32 %v923_v46  ;;  %v867_v2 = vmul.f32 1.442695, %v786_v28  ;;  %1013 = vadd.xlane.f32.xlu1 %v1012_v7  ;;  %1016 = vadd.xlane.f32.xlu0 %v1015_v26  ;;  %v702_v9 = vpop.xlane.xlu1 %701 }
 0x1ff   : > { %v747_v63 = vpop.xlane.xlu0 %746  ;;  %v1625_v8 = vpop.eup %1624  ;;  %1650 = vpow2.f32 %v925_v15  ;;  %v787_v36 = vsub.f32 %v2355_v38, %v702_v9  ;;  %v788_v19 = vsub.f32 -inf, %v702_v9 }
 0x200   : > { %v817_v61 = vsub.f32 %v2348_v31, %v747_v63  ;;  %v2544_v58 = vpop.eup %1626  ;;  %1652 = vpow2.f32 %v927_v34  ;;  %v818_v50 = vsub.f32 -inf, %v747_v63  ;;  %v973_v46 = vadd.f32 %v1625_v8, %v2540_v55 }
 0x201   : > { %v1629_v53 = vpop.eup %1628  ;;  %1654 = vpow2.f32 %v865_v60  ;;  %v869_v5 = vmul.f32 1.442695, %v787_v36  ;;  %v871_v49 = vmul.f32 1.442695, %v788_v19  ;;  %v1018_v60 = vadd.f32 %v1621_v30, %v2536_v45 }
 0x202   : > { %v929_v48 = vmul.f32 1.442695, %v817_v61  ;;  %v2548_v52 = vpop.eup %1630  ;;  %1656 = vpow2.f32 %v867_v2  ;;  %v931_v38 = vmul.f32 1.442695, %v818_v50  ;;  %971 = vadd.xlane.f32.xlu1 %v970_v16  ;;  %974 = vadd.xlane.f32.xlu0 %v973_v46  ;;  %v750_v31 = vpop.xlane.xlu1 %749 }
 0x203   : > { %v705_v17 = vpop.xlane.xlu0 %704  ;;  %v1633_v28 = vpop.eup %1632  ;;  %1658 = vpow2.f32 %v869_v5  ;;  %v819_v7 = vsub.f32 %v2370_v57, %v750_v31  ;;  %v820_v1 = vsub.f32 -inf, %v750_v31 }
 0x204   : > { %v789_v26 = vsub.f32 %v2377_v0, %v705_v17  ;;  %v2552_v15 = vpop.eup %1634  ;;  %1660 = vpow2.f32 %v871_v49  ;;  %v790_v34 = vsub.f32 -inf, %v705_v17  ;;  %v1021_v2 = vadd.f32 %v1633_v28, %v2548_v52 }
 0x205   : > { %v1637_v9 = vpop.eup %1636  ;;  %1662 = vpow2.f32 %v929_v48  ;;  %v933_v63 = vmul.f32 1.442695, %v819_v7  ;;  %v935_v8 = vmul.f32 1.442695, %v820_v1  ;;  %v976_v48 = vadd.f32 %v1629_v53, %v2544_v58 }
 0x206   : > { %v873_v36 = vmul.f32 1.442695, %v789_v26  ;;  %v2556_v19 = vpop.eup %1638  ;;  %1664 = vpow2.f32 %v931_v38  ;;  %v875_v57 = vmul.f32 1.442695, %v790_v34  ;;  %1019 = vadd.xlane.f32.xlu1 %v1018_v60  ;;  %1022 = vadd.xlane.f32.xlu0 %v1021_v2  ;;  %v708_v0 = vpop.xlane.xlu1 %707 }
 0x207   : > { %v753_v61 = vpop.xlane.xlu0 %752  ;;  %v1641_v50 = vpop.eup %1640  ;;  %1666 = vpow2.f32 %v933_v63  ;;  %v791_v16 = vsub.f32 %v2399_v41, %v708_v0  ;;  %v792_v30 = vsub.f32 -inf, %v708_v0 }
 0x208   : > { %v821_v46 = vsub.f32 %v2392_v32, %v753_v61  ;;  %v2560_v5 = vpop.eup %1642  ;;  %1668 = vpow2.f32 %v935_v8  ;;  %v822_v49 = vsub.f32 -inf, %v753_v61  ;;  %v979_v38 = vadd.f32 %v1641_v50, %v2556_v19 }
 0x209   : > { %v1645_v31 = vpop.eup %1644  ;;  %1670 = vpow2.f32 %v873_v36  ;;  %v877_v17 = vmul.f32 1.442695, %v791_v16  ;;  %v879_v28 = vmul.f32 1.442695, %v792_v30  ;;  %v1024_v36 = vadd.f32 %v1637_v9, %v2552_v15 }
 0x20a   : > { %v937_v7 = vmul.f32 1.442695, %v821_v46  ;;  %v2564_v1 = vpop.eup %1646  ;;  %1672 = vpow2.f32 %v875_v57  ;;  %v939_v41 = vmul.f32 1.442695, %v822_v49  ;;  %977 = vadd.xlane.f32.xlu1 %v976_v48  ;;  %980 = vadd.xlane.f32.xlu0 %v979_v38  ;;  %v756_v32 = vpop.xlane.xlu1 %755 }
 0x20b   : > { %v711_v26 = vpop.xlane.xlu0 %710  ;;  %v1649_v34 = vpop.eup %1648  ;;  %1674 = vpow2.f32 %v877_v17  ;;  %v823_v60 = vsub.f32 %v2414_v14, %v756_v32  ;;  %v824_v53 = vsub.f32 -inf, %v756_v32 }
 0x20c   : > { %v793_v2 = vsub.f32 %v2421_v23, %v711_v26  ;;  %v2568_v63 = vpop.eup %1650  ;;  %1676 = vpow2.f32 %v879_v28  ;;  %v794_v8 = vsub.f32 -inf, %v711_v26  ;;  %v1027_v57 = vadd.f32 %v1649_v34, %v2564_v1 }
 0x20d   : > { %v1653_v0 = vpop.eup %1652  ;;  %1678 = vpow2.f32 %v937_v7  ;;  %v941_v61 = vmul.f32 1.442695, %v823_v60  ;;  %v943_v49 = vmul.f32 1.442695, %v824_v53  ;;  %v982_v7 = vadd.f32 %v1645_v31, %v2560_v5 }
 0x20e   : > { %v881_v50 = vmul.f32 1.442695, %v793_v2  ;;  %v2572_v16 = vpop.eup %1654  ;;  %1680 = vpow2.f32 %v939_v41  ;;  %v883_v30 = vmul.f32 1.442695, %v794_v8  ;;  %1025 = vadd.xlane.f32.xlu1 %v1024_v36  ;;  %1028 = vadd.xlane.f32.xlu0 %v1027_v57  ;;  %v714_v14 = vpop.xlane.xlu1 %713  ;;  %v1030_v2 = vadd.f32 %v1653_v0, %v2568_v63 }
 0x20f   : > { %v759_v23 = vpop.xlane.xlu0 %758  ;;  %v1657_v46 = vpop.eup %1656  ;;  %v795_v48 = vsub.f32 %v2443_v37, %v714_v14  ;;  %v796_v38 = vsub.f32 -inf, %v714_v14  ;;  %1682 = vpow2.f32 %v941_v61 }
 0x210   : > { %v825_v9 = vsub.f32 %v2436_v3, %v759_v23  ;;  %v2576_v17 = vpop.eup %1658  ;;  %v826_v28 = vsub.f32 -inf, %v759_v23  ;;  %v985_v41 = vadd.f32 %v1657_v46, %v2572_v16  ;;  %1684 = vpow2.f32 %v881_v50 }
 0x211   : > { %v1661_v32 = vpop.eup %1660  ;;  %v885_v26 = vmul.f32 1.442695, %v795_v48  ;;  %1686 = vpow2.f32 %v883_v30  ;;  %v887_v36 = vmul.f32 1.442695, %v796_v38 }
 0x212   : > { %v945_v34 = vmul.f32 1.442695, %v825_v9  ;;  %v2580_v60 = vpop.eup %1662  ;;  %v947_v53 = vmul.f32 1.442695, %v826_v28  ;;  %983 = vadd.xlane.f32.xlu1 %v982_v7  ;;  %986 = vadd.xlane.f32.xlu0 %v985_v41  ;;  %v762_v37 = vpop.xlane.xlu1 %761  ;;  %1688 = vpow2.f32 %v943_v49 }
 0x213   : > { %v717_v3 = vpop.xlane.xlu0 %716  ;;  %v1665_v8 = vpop.eup %1664  ;;  %v827_v31 = vsub.f32 %v2458_v62, %v762_v37  ;;  %1690 = vpow2.f32 %v885_v26  ;;  %v828_v50 = vsub.f32 -inf, %v762_v37 }
 0x214   : > { %v797_v57 = vsub.f32 %v2465_v40, %v717_v3  ;;  %v2585_v61 = vpop.eup %1666  ;;  %v798_v14 = vsub.f32 -inf, %v717_v3  ;;  %v1033_v30 = vadd.f32 %v1665_v8, %v2580_v60  ;;  %1692 = vpow2.f32 %v945_v34 }
 0x215   : > { %v1669_v23 = vpop.eup %1668  ;;  %1694 = vpow2.f32 %v947_v53  ;;  %v988_v40 = vadd.f32 %v1661_v32, %v2576_v17  ;;  %v949_v9 = vmul.f32 1.442695, %v827_v31  ;;  %v951_v26 = vmul.f32 1.442695, %v828_v50 }
 0x216   : > { %v889_v46 = vmul.f32 1.442695, %v797_v57  ;;  %v2588_v48 = vpop.eup %1670  ;;  %v891_v0 = vmul.f32 1.442695, %v798_v14  ;;  %1031 = vadd.xlane.f32.xlu1 %v1030_v2  ;;  %1034 = vadd.xlane.f32.xlu0 %v1033_v30  ;;  %v720_v49 = vpop.xlane.xlu1 %719  ;;  %1696 = vpow2.f32 %v887_v36  ;;  %v1036_v57 = vadd.f32 %v1669_v23, %v2585_v61 }
 0x217   : > { %v765_v62 = vpop.xlane.xlu0 %764  ;;  %v1673_v38 = vpop.eup %1672  ;;  %v799_v28 = vsub.f32 %v2487_v43, %v720_v49  ;;  %v800_v34 = vsub.f32 -inf, %v720_v49 }
 0x218   : > { %v829_v7 = vsub.f32 %v2480_v54, %v765_v62  ;;  %v2593_v41 = vpop.eup %1674  ;;  %v830_v37 = vsub.f32 -inf, %v765_v62  ;;  %v991_v53 = vadd.f32 %v1673_v38, %v2588_v48  ;;  %1698 = vpow2.f32 %v889_v46 }
 0x219   : > { %v1677_v3 = vpop.eup %1676  ;;  %1700 = vpow2.f32 %v891_v0  ;;  %v893_v54 = vmul.f32 1.442695, %v799_v28  ;;  %v895_v50 = vmul.f32 1.442695, %v800_v34 }
 0x21a   : > { %v953_v2 = vmul.f32 1.442695, %v829_v7  ;;  %v2596_v8 = vpop.eup %1678  ;;  %v955_v32 = vmul.f32 1.442695, %v830_v37  ;;  %989 = vadd.xlane.f32.xlu1 %v988_v40  ;;  %992 = vadd.xlane.f32.xlu0 %v991_v53  ;;  %v768_v36 = vpop.xlane.xlu1 %767  ;;  %1702 = vpow2.f32 %v949_v9  ;;  %v994_v23 = vadd.f32 %v1677_v3, %v2593_v41 }
 0x21b   : > { %v1681_v43 = vpop.eup %1680  ;;  %v831_v31 = vsub.f32 %v2496_v27, %v768_v36  ;;  %1704 = vpow2.f32 %v951_v26  ;;  %v832_v14 = vsub.f32 -inf, %v768_v36 }
 0x21c   : > { %v1039_v30 = vadd.f32 %v1681_v43, %v2596_v8  ;;  %v2601_v46 = vpop.eup %1682  ;;  %1706 = vpow2.f32 %v953_v2 }
 0x21d   : > { %v2603_v0 = vpop.eup %1684  ;;  %1708 = vpow2.f32 %v955_v32  ;;  %v957_v62 = vmul.f32 1.442695, %v831_v31  ;;  %v959_v27 = vmul.f32 1.442695, %v832_v14 }
 0x21e   : > { %1037 = vadd.xlane.f32.xlu1 %v1036_v57  ;;  %1040 = vadd.xlane.f32.xlu0 %v1039_v30  ;;  %v1687_v49 = vpop.eup %1686  ;;  %1710 = vpow2.f32 %v893_v54 }
 0x21f   : > { %v1689_v40 = vpop.eup %1688  ;;  %1712 = vpow2.f32 %v895_v50  ;;  %v997_v38 = vadd.f32 %v1687_v49, %v2603_v0 }
 0x220   : > { %v2607_v9 = vpop.eup %1690  ;;  %1714 = vpow2.f32 %v957_v62  ;;  %v1042_v34 = vadd.f32 %v1689_v40, %v2601_v46 }
 0x221   : > { %v2609_v28 = vpop.eup %1692  ;;  %1716 = vpow2.f32 %v959_v27 }
 0x222   : > { %995 = vadd.xlane.f32.xlu1 %v994_v23  ;;  %998 = vadd.xlane.f32.xlu0 %v997_v38  ;;  %v1695_v7 = vpop.eup %1694 }
 0x223   : > { %v1697_v26 = vpop.eup %1696  ;;  %v1045_v37 = vadd.f32 %v1695_v7, %v2609_v28 }
 0x224   : > { %v1000_v32 = vadd.f32 %v1697_v26, %v2607_v9 }
 0x225   : > { %v2613_v53 = vpop.eup %1698 }
 0x226   : > { %1043 = vadd.xlane.f32.xlu1 %v1042_v34  ;;  %1046 = vadd.xlane.f32.xlu0 %v1045_v37  ;;  %v1701_v3 = vpop.eup %1700 }
 0x227   : > { %v2615_v2 = vpop.eup %1702  ;;  %v1003_v36 = vadd.f32 %v1701_v3, %v2613_v53 }
 0x228   : > { %v1705_v43 = vpop.eup %1704 }
 0x229   : > { %v2619_v54 = vpop.eup %1706  ;;  %v1048_v50 = vadd.f32 %v1705_v43, %v2615_v2 }
 0x22a   : > { %1001 = vadd.xlane.f32.xlu1 %v1000_v32  ;;  %1004 = vadd.xlane.f32.xlu0 %v1003_v36  ;;  %v1709_v31 = vpop.eup %1708  ;;  %v1153_v32 = vmul.f32 0.2, %v2145_v10 }
 0x22b   : > { %v2621_v57 = vpop.eup %1710  ;;  %v1051_v14 = vadd.f32 %v1709_v31, %v2619_v54 }
 0x22c   : > { %v1713_v30 = vpop.eup %1712 }
 0x22d   : > { %v2625_v49 = vpop.eup %1714  ;;  %v1006_v62 = vadd.f32 %v1713_v30, %v2621_v57  ;;  %v1185_v30 = vmul.f32 0.2, %v2149_v11  ;;  %v1157_v11 = vmul.f32 0.2, %v2185_v33 }
 0x22e   : > { %1049 = vadd.xlane.f32.xlu1 %v1048_v50  ;;  %1052 = vadd.xlane.f32.xlu0 %v1051_v14  ;;  %v1717_v40 = vpop.eup %1716 }
 0x22f   : > { %v1054_v27 = vadd.f32 %v1717_v40, %v2625_v49 }
 0x232   : > { %1007 = vadd.xlane.f32.xlu1 %v1006_v62 }
 0x236   : > { %1055 = vadd.xlane.f32.xlu1 %v1054_v27 }
 0x279   : > { %v963_v23 = vpop.xlane.xlu0 %962 }
 0x27a   : > { %1718 = vrcp.f32 %v963_v23 }
 0x27f   : > { %v1011_v38 = vpop.xlane.xlu0 %1010 }
 0x280   : > { %1720 = vrcp.f32 %v1011_v38  ;;  %v1155_v38 = vmul.f32 0.2, %v2163_v22 }
 0x283   : > { %v966_v7 = vpop.xlane.xlu1 %965  ;;  %v969_v26 = vpop.xlane.xlu0 %968 }
 0x284   : > { %1722 = vrcp.f32 %v966_v7 }
 0x285   : > { %1724 = vrcp.f32 %v969_v26 }
 0x287   : > { %v1719_v34 = vpop.eup %1718  ;;  %v1014_v37 = vpop.xlane.xlu1 %1013 }
 0x288   : > { %v1017_v3 = vpop.xlane.xlu0 %1016  ;;  %v1089_v36 = vmul.f32 %v1719_v34, %v2510_v51  ;;  %1726 = vrcp.f32 %v1014_v37 }
 0x289   : > { %1728 = vrcp.f32 %v1017_v3 }
 0x28a   : > { %v1217_v43 = vsel %vm607_vm0, %v1089_v36, %v1153_v32 }
 0x28b   : > { %1281 = vst [vmem:[%s2172_s28] sm:$0xff] %v1217_v43  ;;  %v972_v31 = vpop.xlane.xlu1 %971 }
 0x28c   : > { %v975_v50 = vpop.xlane.xlu0 %974  ;;  %1730 = vrcp.f32 %v972_v31 }
 0x28d   : > { %v1721_v14 = vpop.eup %1720  ;;  %1732 = vrcp.f32 %v975_v50 }
 0x28e   : > { %v1121_v62 = vmul.f32 %v1721_v14, %v2517_v42 }
 0x28f   : > { %v1020_v40 = vpop.xlane.xlu1 %1019 }
 0x290   : > { %v1023_v10 = vpop.xlane.xlu0 %1022  ;;  %v1249_v51 = vsel %vm607_vm0, %v1121_v62, %v1185_v30  ;;  %1734 = vrcp.f32 %v1020_v40 }
 0x291   : > { %v1723_v27 = vpop.eup %1722  ;;  %1313 = vst [vmem:[%s2172_s28 + $0x100] sm:$0xff] %v1249_v51  ;;  %1736 = vrcp.f32 %v1023_v10 }
 0x292   : > { %v1725_v23 = vpop.eup %1724  ;;  %v1091_v7 = vmul.f32 %v1723_v27, %v2524_v25  ;;  %v1187_v25 = vmul.f32 0.2, %v2159_v21 }
 0x293   : > { %v1093_v42 = vmul.f32 %v1725_v23, %v2521_v18  ;;  %v978_v26 = vpop.xlane.xlu1 %977  ;;  %v1189_v18 = vmul.f32 0.2, %v2189_v35 }
 0x294   : > { %v981_v34 = vpop.xlane.xlu0 %980  ;;  %v1219_v37 = vsel %vm607_vm0, %v1091_v7, %v1155_v38  ;;  %1738 = vrcp.f32 %v978_v26 }
 0x295   : > { %v1727_v3 = vpop.eup %1726  ;;  %1283 = vst [vmem:[%s2172_s28 + $0x10] sm:$0xff] %v1219_v37  ;;  %v1221_v32 = vsel %vm607_vm0, %v1093_v42, %v1157_v11  ;;  %1740 = vrcp.f32 %v981_v34 }
 0x296   : > { %v1729_v22 = vpop.eup %1728  ;;  %1285 = vst [vmem:[%s2172_s28 + $0x20] sm:$0xff] %v1221_v32  ;;  %v1123_v33 = vmul.f32 %v1727_v3, %v2515_v20  ;;  %v1159_v20 = vmul.f32 0.2, %v2206_v44 }
 0x297   : > { %v1125_v36 = vmul.f32 %v1729_v22, %v2532_v13  ;;  %v1026_v43 = vpop.xlane.xlu1 %1025  ;;  %v1161_v13 = vmul.f32 0.2, %v2228_v56 }
 0x298   : > { %v1029_v31 = vpop.xlane.xlu0 %1028  ;;  %v1251_v50 = vsel %vm607_vm0, %v1123_v33, %v1187_v25  ;;  %1742 = vrcp.f32 %v1026_v43 }
 0x299   : > { %v1731_v14 = vpop.eup %1730  ;;  %1315 = vst [vmem:[%s2172_s28 + $0x110] sm:$0xff] %v1251_v50  ;;  %v1253_v30 = vsel %vm607_vm0, %v1125_v36, %v1189_v18  ;;  %1744 = vrcp.f32 %v1029_v31 }
 0x29a   : > { %v1733_v21 = vpop.eup %1732  ;;  %1317 = vst [vmem:[%s2172_s28 + $0x120] sm:$0xff] %v1253_v30  ;;  %v1095_v35 = vmul.f32 %v1731_v14, %v2529_v39  ;;  %v1191_v39 = vmul.f32 0.2, %v2211_v47  ;;  %v2894_v30 = vld [vmem:[#allocation11_spill] sm:$0xff] }
 0x29b   : > { %v1097_v62 = vmul.f32 %v1733_v21, %v2540_v55  ;;  %v984_v40 = vpop.xlane.xlu1 %983  ;;  %v1193_v55 = vmul.f32 0.2, %v2233_v59 }
 0x29c   : > { %v987_v10 = vpop.xlane.xlu0 %986  ;;  %v1223_v51 = vsel %vm607_vm0, %v1095_v35, %v1159_v20  ;;  %1746 = vrcp.f32 %v984_v40 }
 0x29d   : > { %v1735_v27 = vpop.eup %1734  ;;  %1287 = vst [vmem:[%s2172_s28 + $0x30] sm:$0xff] %v1223_v51  ;;  %v1225_v23 = vsel %vm607_vm0, %v1097_v62, %v1161_v13  ;;  %1748 = vrcp.f32 %v987_v10 }
 0x29e   : > { %v1737_v44 = vpop.eup %1736  ;;  %1289 = vst [vmem:[%s2172_s28 + $0x40] sm:$0xff] %v1225_v23  ;;  %v1127_v56 = vmul.f32 %v1735_v27, %v2536_v45  ;;  %v1163_v45 = vmul.f32 0.2, %v2250_v4  ;;  %v2896_v27 = vld [vmem:[#allocation12_spill] sm:$0xff]  ;;  %v2897_v23 = vld [vmem:[#allocation14_spill] sm:$0xff] }
 0x29f   : > { %v1129_v38 = vmul.f32 %v1737_v44, %v2548_v52  ;;  %v1032_v7 = vpop.xlane.xlu1 %1031  ;;  %v1165_v52 = vmul.f32 0.2, %v2272_v24  ;;  %v1201_v44 = vmul.f32 0.2, %v2897_v23  ;;  %v2906_v23 = vld [vmem:[#allocation23_spill] sm:$0xff] }
 0x2a0   : > { %v1035_v11 = vpop.xlane.xlu0 %1034  ;;  %v1255_v42 = vsel %vm607_vm0, %v1127_v56, %v1191_v39  ;;  %1750 = vrcp.f32 %v1032_v7 }
 0x2a1   : > { %v1739_v26 = vpop.eup %1738  ;;  %1319 = vst [vmem:[%s2172_s28 + $0x130] sm:$0xff] %v1255_v42  ;;  %v1257_v34 = vsel %vm607_vm0, %v1129_v38, %v1193_v55  ;;  %1752 = vrcp.f32 %v1035_v11 }
 0x2a2   : > { %v1741_v47 = vpop.eup %1740  ;;  %1321 = vst [vmem:[%s2172_s28 + $0x140] sm:$0xff] %v1257_v34  ;;  %v1099_v59 = vmul.f32 %v1739_v26, %v2544_v58  ;;  %v1195_v58 = vmul.f32 0.2, %v2255_v12  ;;  %v2898_v26 = vld [vmem:[#allocation15_spill] sm:$0xff]  ;;  %v2899_v34 = vld [vmem:[#allocation17_spill] sm:$0xff] }
 0x2a3   : > { %v1101_v37 = vmul.f32 %v1741_v47, %v2556_v19  ;;  %v990_v3 = vpop.xlane.xlu1 %989  ;;  %v1197_v19 = vmul.f32 0.2, %v2277_v29  ;;  %v1173_v47 = vmul.f32 0.2, %v2899_v34 }
 0x2a4   : > { %v993_v32 = vpop.xlane.xlu0 %992  ;;  %v1227_v22 = vsel %vm607_vm0, %v1099_v59, %v1163_v45  ;;  %1754 = vrcp.f32 %v990_v3 }
 0x2a5   : > { %v1743_v25 = vpop.eup %1742  ;;  %1291 = vst [vmem:[%s2172_s28 + $0x50] sm:$0xff] %v1227_v22  ;;  %v1229_v33 = vsel %vm607_vm0, %v1101_v37, %v1165_v52  ;;  %1756 = vrcp.f32 %v993_v32 }
 0x2a6   : > { %v1745_v4 = vpop.eup %1744  ;;  %1293 = vst [vmem:[%s2172_s28 + $0x60] sm:$0xff] %v1229_v33  ;;  %v1131_v24 = vmul.f32 %v1743_v25, %v2552_v15  ;;  %v1167_v15 = vmul.f32 0.2, %v2894_v30  ;;  %v2900_v25 = vld [vmem:[#allocation16_spill] sm:$0xff]  ;;  %v2901_v33 = vld [vmem:[#allocation18_spill] sm:$0xff] }
 0x2a7   : > { %v1133_v18 = vmul.f32 %v1745_v4, %v2564_v1  ;;  %v1038_v36 = vpop.xlane.xlu1 %1037  ;;  %v2895_v1 = vld [vmem:[#allocation13_spill] sm:$0xff]  ;;  %v1205_v4 = vmul.f32 0.2, %v2901_v33 }
 0x2a8   : > { %v1041_v43 = vpop.xlane.xlu0 %1040  ;;  %v1259_v31 = vsel %vm607_vm0, %v1131_v24, %v1195_v58  ;;  %1758 = vrcp.f32 %v1038_v36  ;;  %v1169_v21 = vmul.f32 0.2, %v2895_v1 }
 0x2a9   : > { %v1747_v50 = vpop.eup %1746  ;;  %1323 = vst [vmem:[%s2172_s28 + $0x150] sm:$0xff] %v1259_v31  ;;  %v1261_v14 = vsel %vm607_vm0, %v1133_v18, %v1197_v19  ;;  %1760 = vrcp.f32 %v1041_v43 }
 0x2aa   : > { %v1749_v12 = vpop.eup %1748  ;;  %1325 = vst [vmem:[%s2172_s28 + $0x160] sm:$0xff] %v1261_v14  ;;  %v1103_v29 = vmul.f32 %v1747_v50, %v2560_v5  ;;  %v1199_v5 = vmul.f32 0.2, %v2896_v27  ;;  %v2903_v14 = vld [vmem:[#allocation21_spill] sm:$0xff] }
 0x2ab   : > { %v1105_v20 = vmul.f32 %v1749_v12, %v2572_v16  ;;  %v996_v35 = vpop.xlane.xlu1 %995  ;;  %v1177_v12 = vmul.f32 0.2, %v2903_v14 }
 0x2ac   : > { %v999_v13 = vpop.xlane.xlu0 %998  ;;  %v1231_v62 = vsel %vm607_vm0, %v1103_v29, %v1167_v15  ;;  %1762 = vrcp.f32 %v996_v35  ;;  %v2904_v35 = vld [vmem:[#allocation20_spill] sm:$0xff] }
 0x2ad   : > { %v1751_v40 = vpop.eup %1750  ;;  %1295 = vst [vmem:[%s2172_s28 + $0x70] sm:$0xff] %v1231_v62  ;;  %v1233_v10 = vsel %vm607_vm0, %v1105_v20, %v1169_v21  ;;  %1764 = vrcp.f32 %v999_v13  ;;  %v1207_v13 = vmul.f32 0.2, %v2904_v35  ;;  %v2905_v62 = vld [vmem:[#allocation22_spill] sm:$0xff] }
 0x2ae   : > { %v1753_v51 = vpop.eup %1752  ;;  %1297 = vst [vmem:[%s2172_s28 + $0x80] sm:$0xff] %v1233_v10  ;;  %v1135_v16 = vmul.f32 %v1751_v40, %v2568_v63  ;;  %v1171_v63 = vmul.f32 0.2, %v2898_v26 }
 0x2af   : > { %v1137_v39 = vmul.f32 %v1753_v51, %v2580_v60  ;;  %v1044_v56 = vpop.xlane.xlu1 %1043 }
 0x2b0   : > { %v1047_v55 = vpop.xlane.xlu0 %1046  ;;  %v1263_v38 = vsel %vm607_vm0, %v1135_v16, %v1199_v5  ;;  %1766 = vrcp.f32 %v1044_v56 }
 0x2b1   : > { %v1755_v7 = vpop.eup %1754  ;;  %1327 = vst [vmem:[%s2172_s28 + $0x170] sm:$0xff] %v1263_v38  ;;  %v1265_v11 = vsel %vm607_vm0, %v1137_v39, %v1201_v44  ;;  %1768 = vrcp.f32 %v1047_v55  ;;  %v1179_v44 = vmul.f32 0.2, %v2906_v23  ;;  %v2907_v39 = vld [vmem:[#allocation25_spill] sm:$0xff] }
 0x2b2   : > { %v1757_v42 = vpop.eup %1756  ;;  %1329 = vst [vmem:[%s2172_s28 + $0x180] sm:$0xff] %v1265_v11  ;;  %v1107_v60 = vmul.f32 %v1755_v7, %v2576_v17  ;;  %v1203_v17 = vmul.f32 0.2, %v2900_v25 }
 0x2b3   : > { %v1109_v45 = vmul.f32 %v1757_v42, %v2588_v48  ;;  %v1002_v59 = vpop.xlane.xlu1 %1001  ;;  %v2908_v42 = vld [vmem:[#allocation24_spill] sm:$0xff] }
 0x2b4   : > { %v1005_v52 = vpop.xlane.xlu0 %1004  ;;  %v1235_v37 = vsel %vm607_vm0, %v1107_v60, %v1171_v63  ;;  %1770 = vrcp.f32 %v1002_v59  ;;  %v1211_v26 = vmul.f32 0.2, %v2908_v42  ;;  %v2909_v63 = vld [vmem:[#allocation26_spill] sm:$0xff]  ;;  %v2910_v59 = vld [vmem:[#allocation27_spill] sm:$0xff] }
 0x2b5   : > { %v1759_v3 = vpop.eup %1758  ;;  %1299 = vst [vmem:[%s2172_s28 + $0x90] sm:$0xff] %v1235_v37  ;;  %v1237_v32 = vsel %vm607_vm0, %v1109_v45, %v1173_v47  ;;  %1772 = vrcp.f32 %v1005_v52  ;;  %v1183_v52 = vmul.f32 0.2, %v2910_v59 }
 0x2b6   : > { %v1761_v22 = vpop.eup %1760  ;;  %1301 = vst [vmem:[%s2172_s28 + $0xa0] sm:$0xff] %v1237_v32  ;;  %v1139_v48 = vmul.f32 %v1759_v3, %v2585_v61  ;;  %v2902_v61 = vld [vmem:[#allocation19_spill] sm:$0xff]  ;;  %v2911_v3 = vld [vmem:[#allocation28_spill] sm:$0xff] }
 0x2b7   : > { %v1141_v58 = vmul.f32 %v1761_v22, %v2596_v8  ;;  %v1050_v24 = vpop.xlane.xlu1 %1049  ;;  %v1175_v50 = vmul.f32 0.2, %v2902_v61  ;;  %v1215_v32 = vmul.f32 0.2, %v2911_v3 }
 0x2b8   : > { %v1053_v19 = vpop.xlane.xlu0 %1052  ;;  %v1267_v18 = vsel %vm607_vm0, %v1139_v48, %v1203_v17  ;;  %1774 = vrcp.f32 %v1050_v24 }
 0x2b9   : > { %v1763_v36 = vpop.eup %1762  ;;  %1331 = vst [vmem:[%s2172_s28 + $0x190] sm:$0xff] %v1267_v18  ;;  %v1269_v43 = vsel %vm607_vm0, %v1141_v58, %v1205_v4  ;;  %1776 = vrcp.f32 %v1053_v19 }
 0x2ba   : > { %v1765_v31 = vpop.eup %1764  ;;  %1333 = vst [vmem:[%s2172_s28 + $0x1a0] sm:$0xff] %v1269_v43  ;;  %v1111_v8 = vmul.f32 %v1763_v36, %v2593_v41 }
 0x2bb   : > { %v1113_v30 = vmul.f32 %v1765_v31, %v2603_v0  ;;  %v1008_v15 = vpop.xlane.xlu1 %1007  ;;  %v1209_v0 = vmul.f32 0.2, %v2905_v62 }
 0x2bc   : > { %v1239_v29 = vsel %vm607_vm0, %v1111_v8, %v1175_v50  ;;  %1778 = vrcp.f32 %v1008_v15 }
 0x2bd   : > { %v1767_v1 = vpop.eup %1766  ;;  %1303 = vst [vmem:[%s2172_s28 + $0xb0] sm:$0xff] %v1239_v29  ;;  %v1241_v21 = vsel %vm607_vm0, %v1113_v30, %v1177_v12 }
 0x2be   : > { %v1769_v20 = vpop.eup %1768  ;;  %1305 = vst [vmem:[%s2172_s28 + $0xc0] sm:$0xff] %v1241_v21  ;;  %v1143_v41 = vmul.f32 %v1767_v1, %v2601_v46 }
 0x2bf   : > { %v1145_v40 = vmul.f32 %v1769_v20, %v2609_v28  ;;  %v1056_v10 = vpop.xlane.xlu1 %1055  ;;  %v1181_v28 = vmul.f32 0.2, %v2907_v39 }
 0x2c0   : > { %v1271_v51 = vsel %vm607_vm0, %v1143_v41, %v1207_v13  ;;  %1780 = vrcp.f32 %v1056_v10 }
 0x2c1   : > { %v1771_v27 = vpop.eup %1770  ;;  %1335 = vst [vmem:[%s2172_s28 + $0x1b0] sm:$0xff] %v1271_v51  ;;  %v1273_v5 = vsel %vm607_vm0, %v1145_v40, %v1209_v0 }
 0x2c2   : > { %v1773_v16 = vpop.eup %1772  ;;  %1337 = vst [vmem:[%s2172_s28 + $0x1c0] sm:$0xff] %v1273_v5  ;;  %v1115_v46 = vmul.f32 %v1771_v27, %v2607_v9 }
 0x2c3   : > { %v1117_v56 = vmul.f32 %v1773_v16, %v2613_v53  ;;  %v1213_v53 = vmul.f32 0.2, %v2909_v63 }
 0x2c4   : > { %v1243_v55 = vsel %vm607_vm0, %v1115_v46, %v1179_v44 }
 0x2c5   : > { %v1775_v38 = vpop.eup %1774  ;;  %1307 = vst [vmem:[%s2172_s28 + $0xd0] sm:$0xff] %v1243_v55  ;;  %v1245_v7 = vsel %vm607_vm0, %v1117_v56, %v1181_v28 }
 0x2c6   : > { %v1777_v11 = vpop.eup %1776  ;;  %1309 = vst [vmem:[%s2172_s28 + $0xe0] sm:$0xff] %v1245_v7  ;;  %v1147_v9 = vmul.f32 %v1775_v38, %v2615_v2 }
 0x2c7   : > { %v1149_v60 = vmul.f32 %v1777_v11, %v2619_v54 }
 0x2c8   : > { %v1275_v34 = vsel %vm607_vm0, %v1147_v9, %v1211_v26 }
 0x2c9   : > { %v1779_v47 = vpop.eup %1778  ;;  %1339 = vst [vmem:[%s2172_s28 + $0x1d0] sm:$0xff] %v1275_v34  ;;  %v1277_v45 = vsel %vm607_vm0, %v1149_v60, %v1213_v53 }
 0x2ca   : > { %1341 = vst [vmem:[%s2172_s28 + $0x1e0] sm:$0xff] %v1277_v45  ;;  %v1119_v2 = vmul.f32 %v1779_v47, %v2621_v57 }
 0x2cc   : > { %v1247_v54 = vsel %vm607_vm0, %v1119_v2, %v1183_v52 }
 0x2cd   : > { %v1781_v37 = vpop.eup %1780  ;;  %1311 = vst [vmem:[%s2172_s28 + $0xf0] sm:$0xff] %v1247_v54 }
 0x2ce   : > { %v1151_v22 = vmul.f32 %v1781_v37, %v2625_v49 }
 0x2d0   : > { %v1279_v57 = vsel %vm607_vm0, %v1151_v22, %v1215_v32 }
 0x2d1   : > { %1343 = vst [vmem:[%s2172_s28 + $0x1f0] sm:$0xff] %v1279_v57 }
 0x2d2   : > { %1849 = shalt.err (!%p1846_p0)
}
 0x2d3   : > { %s1850_s11 = scalar_lea.hbm %s2791_s4, 8192  ;;  %s1854_s30 = scalar_lea.hbm %s2842_s3, 16384 }
 0x2d4   : > { %p1851_p5 = scmp.ne.s32.totalorder %s2791_s4, %s1850_s11  ;;  %p1855_p4 = scmp.lt.s32.totalorder %s2791_s4, %s2842_s3 }
 0x2d5   : > { %p1856_p6 = scmp.lt.s32.totalorder %s1854_s30, %s1850_s11 }
 0x2d6   : > { %p1852_p2 = pnand %p1851_p5, %p2912_p11 }
 0x2d7   : > { %p1857_p8 = por %p1856_p6, %p1855_p4 }
 0x2d8   : > { %p1853_p1 = pneg %p1852_p2 }
 0x2da   : > { %p1858_p3 = pnand %p1857_p8, %p1853_p1 }
 0x2dc   : > { %1861 = shalt.err (!%p1858_p3)
}
 0x2dd   : > { %s1911_s20 = smov 256   ;;  %s1912_s28 = smov 16  }
 0x2de   : > { %1535 = dma.vmem_to_hbm [thread:$0]  (%p2912_p11), %s2793_s17, 8192, %s2791_s4, %s1346_s16, %s1911_s20, %s1911_s20, %s1912_s28  }
 0x2df PF: > { %s1375_s29 = sand.u32 1, %s1892_s12   ;;  %p2913_p7 = scmp.ne.s32.totalorder %s2866_s19, 0 }
 0x2e0   : > { %p2914_p9 = scmp.ge.s32.totalorder %s1904_s15, 2  ;;  %s1376_s22 = scalar_lea.sflag [#allocation4], %s1375_s29 }
 0x2e2   : > { %p1546_p10 = pnand %p2914_p9, %p2913_p7 }
 0x2e4   : > { %p1547_p12 = pneg %p1546_p10 }
 0x2e6   : > { %1887 = dma.done.wait (%p1547_p12), %s1376_s22, 8192  }
 0x2e7   : > { %1889 = vsyncadd (%p1547_p12), %s1376_s22, 4294959104  ;;  %p17_p13 = scmp.ge.s32.totalorder %s1987_s24, 4   ;;  %s2915_s12 = smov %s1896_s13 }
 0x2e8   : > { %s2916_s13 = smov %s1900_s14  ;;  %s2917_s14 = smov %s2007_s5 }
 0x2e9   : > { %s2918_s15 = smov %s1987_s24  ;;  %19 = sbr.rel (!%p17_p13) target bundleno = 6 (0x6), region = 81 }
 0x2ee   :  { %1381 = vsyncpa [#allocation3], 1 }
 0x2ef   :  { %1383 = vsyncpa [#allocation3 + $0x1], 1 }
 0x2f0   :  { %1384 = vsyncpa [#allocation6], 1 }
 0x2f1   :  { %1385 = vsyncpa [#allocation4], 1 }
 0x2f2   :  { %1387 = vsyncpa [#allocation4 + $0x1], 1 }

</bundles_post_ra>
